<compile_context>
chip_gen: v6e
topology: v6e:2x2x1
jax: 0.10.0
libtpu: 0.0.40
codegen_flags: <defaults>
</compile_context>

<pallas_src>
import functools

import jax
import jax.numpy as jnp
import numpy as np
from jax.experimental import pallas as pl
from jax.experimental.pallas import tpu as pltpu


# ---------------------------------------------------------------------------
# Helpers
# ---------------------------------------------------------------------------
def _round_up(v, m):
    return ((v + m - 1) // m) * m


def _pad2(a, shape):
    if a.shape == tuple(shape):
        return a
    return jnp.pad(a, [(0, s - d) for d, s in zip(a.shape, shape)])


def _pick_tile(dim, pref, min_blocks=1):
    """Largest candidate tile that divides `dim`, preferring >= min_blocks blocks."""
    candidates = (pref, 512, 256, 128)
    for t in candidates:
        if t <= dim and dim % t == 0 and dim // t >= min_blocks:
            return t
    for t in candidates:
        if t <= dim and dim % t == 0:
            return t
    return dim


# ---------------------------------------------------------------------------
# Kernel 1: support = x @ W   (tiny; tiled only over node rows)
# ---------------------------------------------------------------------------
def _support_kernel(x_ref, w_ref, out_ref):
    out_ref[...] = jnp.dot(
        x_ref[...], w_ref[...], preferred_element_type=jnp.float32
    ).astype(out_ref.dtype)


# ---------------------------------------------------------------------------
# Kernel 2: output = adj @ support   (tiled, f32 accumulation on the MXU)
# ---------------------------------------------------------------------------
def _adj_support_kernel(adj_ref, sup_ref, out_ref, acc_ref):
    # adj_ref : (TM, TK)  adjacency block (row tile i, contraction tile k)
    # sup_ref : (TK, TN)  support block   (contraction tile k, feature tile j)
    # out_ref : (TM, TN)  resident across the k grid axis
    # acc_ref : (TM, TN)  f32 accumulator scratch
    @pl.when(pl.program_id(2) == 0)
    def _init():
        acc_ref[...] = jnp.zeros_like(acc_ref)

    acc_ref[...] += jnp.dot(
        adj_ref[...], sup_ref[...], preferred_element_type=jnp.float32
    )

    @pl.when(pl.program_id(2) == pl.num_programs(2) - 1)
    def _finalize():
        out_ref[...] = acc_ref[...].astype(out_ref.dtype)


# ---------------------------------------------------------------------------
# Wrapper: padding + tiling + two pallas_calls.
# ---------------------------------------------------------------------------
def graph_convolution1_forward(x, adj, weight, *, tm=512, tn=512, tk=512,
                               compute_dtype=None):
    """output = adj @ (x @ weight), matching GraphConvolution1.forward.

    compute_dtype: optional dtype (e.g. jnp.bfloat16) for the matmul operands;
    accumulation stays f32. Default: keep the input dtype (exact vs reference).
    """
    N, Fin = x.shape
    Fout = weight.shape[1]
    assert adj.shape == (N, N)
    assert weight.shape[0] == Fin

    out_dtype = x.dtype
    cdtype = jnp.dtype(compute_dtype) if compute_dtype is not None else jnp.dtype(x.dtype)

    # Pad to multiples of 128 only when needed (zero padding is exact here).
    Np = _round_up(N, 128)
    Fin_p = _round_up(Fin, 128)
    Fout_p = _round_up(Fout, 128)

    adj_p = _pad2(adj, (Np, Np)).astype(cdtype)
    x_p = _pad2(x, (Np, Fin_p))
    w_p = _pad2(weight, (Fin_p, Fout_p))

    # ---- Stage 1: support = x @ W (computed once, streamed once) ----------
    TS = _pick_tile(Np, 512)
    support = pl.pallas_call(
        _support_kernel,
        out_shape=jax.ShapeDtypeStruct((Np, Fout_p), cdtype),
        grid_spec=pltpu.PrefetchScalarGridSpec(
            num_scalar_prefetch=0,
            grid=(Np // TS,),
            in_specs=[
                pl.BlockSpec((TS, Fin_p), lambda i: (i, 0)),      # x rows
                pl.BlockSpec((Fin_p, Fout_p), lambda i: (0, 0)),  # full W
            ],
            out_specs=pl.BlockSpec((TS, Fout_p), lambda i: (i, 0)),
        ),
        compiler_params=pltpu.CompilerParams(
            dimension_semantics=("parallel",)),
        cost_estimate=pl.CostEstimate(
            flops=int(2 * Np * Fin_p * Fout_p),
            transcendentals=0,
            bytes_accessed=int(4 * (Np * Fin_p + Fin_p * Fout_p + Np * Fout_p))),
    )(x_p, w_p)

    # ---- Stage 2: output = adj @ support -----------------------------------
    # TN covers all of Fout when it fits (<= 512) so adj is streamed exactly once.
    TN = Fout_p if Fout_p <= 512 else _pick_tile(Fout_p, tn)
    n_j = Fout_p // TN
    # Keep >= 2 tiles across the parallel axes (v7x has 2 TensorCores/chip).
    min_i_blocks = 2 if n_j < 2 else 1
    TM = _pick_tile(Np, tm, min_blocks=min_i_blocks)
    TK = _pick_tile(Np, tk)

    grid = (Np // TM, n_j, Np // TK)

    itemsize = cdtype.itemsize
    flops = 2 * Np * Np * Fout_p
    bytes_accessed = (
        itemsize * Np * Np * n_j                 # adj streamed once per j tile
        + itemsize * Np * Fout_p * (Np // TM)    # support re-read per row tile
        + jnp.dtype(out_dtype).itemsize * Np * Fout_p  # output writeback
    )

    out_p = pl.pallas_call(
        _adj_support_kernel,
        out_shape=jax.ShapeDtypeStruct((Np, Fout_p), out_dtype),
        grid_spec=pltpu.PrefetchScalarGridSpec(
            num_scalar_prefetch=0,
            grid=grid,
            in_specs=[
                pl.BlockSpec((TM, TK), lambda i, j, k: (i, k)),  # adj
                pl.BlockSpec((TK, TN), lambda i, j, k: (k, j)),  # support
            ],
            out_specs=pl.BlockSpec((TM, TN), lambda i, j, k: (i, j)),
            scratch_shapes=[pltpu.VMEM((TM, TN), jnp.float32)],
        ),
        compiler_params=pltpu.CompilerParams(
            dimension_semantics=("parallel", "parallel", "arbitrary")),
        cost_estimate=pl.CostEstimate(
            flops=int(flops), transcendentals=0,
            bytes_accessed=int(bytes_accessed)),
    )(adj_p, support)

    if Np == N and Fout_p == Fout:
        return out_p
    return out_p[:N, :Fout]


# ---------------------------------------------------------------------------
# Pure numpy reference (mirrors the PyTorch forward).
# ---------------------------------------------------------------------------
def _reference(x, adj, weight):
    x = np.asarray(x, np.float64)
    adj = np.asarray(adj, np.float64)
    weight = np.asarray(weight, np.float64)
    support = x @ weight
    return adj @ support


if __name__ == "__main__":
    # Small synthetic shapes consistent with the module.
    num_nodes = 512       # N (adjacency is N x N)
    in_features = 32
    out_features = 64

    key = jax.random.PRNGKey(0)
    kx, kadj, kw, kb = jax.random.split(key, 4)

    x = jax.random.normal(kx, (num_nodes, in_features), dtype=jnp.float32)
    adj = jax.random.normal(kadj, (num_nodes, num_nodes), dtype=jnp.float32)

    # reset_parameters(): uniform(-stdv, stdv) with stdv = 1/sqrt(out_features).
    stdv = 1.0 / np.sqrt(out_features)
    weight = jax.random.uniform(kw, (in_features, out_features),
                                dtype=jnp.float32, minval=-stdv, maxval=stdv)
    bias = jax.random.uniform(kb, (out_features,), dtype=jnp.float32,
                              minval=-stdv, maxval=stdv)  # unused by forward()

    fwd = jax.jit(graph_convolution1_forward)
    out = fwd(x, adj, weight)
    out = jax.block_until_ready(out)

    ref = _reference(x, adj, weight)
    np.testing.assert_allclose(np.asarray(out), ref, rtol=5e-4, atol=5e-4)
    assert out.shape == (num_nodes, out_features)

    print("KERNEL_OK")
</pallas_src>

<mosaic_0001>
module attributes {stable_mosaic.version = 11 : i64} {
  func.func @_support_kernel(%arg0: i32, %arg1: memref<512x128xf32, #tpu.memory_space<vmem>>, %arg2: memref<128x128xf32, #tpu.memory_space<vmem>>, %arg3: memref<512x128xf32, #tpu.memory_space<vmem>>) attributes {dimension_semantics = [#tpu.dimension_semantics<parallel>], iteration_bounds = array<i64: 1>, scalar_prefetch = 0 : i64, scratch_operands = 0 : i64, tpu.core_type = #tpu.core_type<tc>, window_params = [{transform_indices = @transform_0, window_bounds = array<i64: 512, 128>}, {pipeline_mode = #tpu.pipeline_mode<synchronous>, transform_indices = @transform_1, window_bounds = array<i64: 128, 128>}, {transform_indices = @transform_2, window_bounds = array<i64: 512, 128>}]} {
    %c0 = arith.constant 0 : index
    %c0_0 = arith.constant 0 : index
    %0 = vector.load %arg1[%c0, %c0_0] : memref<512x128xf32, #tpu.memory_space<vmem>>, vector<512x128xf32>
    %c0_1 = arith.constant 0 : index
    %c0_2 = arith.constant 0 : index
    %1 = vector.load %arg2[%c0_1, %c0_2] : memref<128x128xf32, #tpu.memory_space<vmem>>, vector<128x128xf32>
    %cst = arith.constant dense<0.000000e+00> : vector<512x128xf32>
    %2 = tpu.matmul %0, %1, %cst {dimension_numbers = #tpu.dot_dimension_numbers<[1], [0], [0], [1], [0, 0, 1, 1], [], []>} : vector<512x128xf32>, vector<128x128xf32>, vector<512x128xf32> -> vector<512x128xf32>
    %c0_3 = arith.constant 0 : index
    %c0_4 = arith.constant 0 : index
    %3 = vector.load %arg3[%c0_3, %c0_4] : memref<512x128xf32, #tpu.memory_space<vmem>>, vector<512x128xf32>
    tpu.vector_store %arg3[%c0_3, %c0_4], %2 {strides = array<i32>} : memref<512x128xf32, #tpu.memory_space<vmem>>, vector<512x128xf32>,
    return
  }
  func.func @transform_0(%arg0: i32) -> (i32, i32) {
    %c0_i32 = arith.constant 0 : i32
    %c0_i32_0 = arith.constant 0 : i32
    return %arg0, %c0_i32 : i32, i32
  }
  func.func @transform_1(%arg0: i32) -> (i32, i32) {
    %c0_i32 = arith.constant 0 : i32
    %c0_i32_0 = arith.constant 0 : i32
    %c0_i32_1 = arith.constant 0 : i32
    return %c0_i32, %c0_i32_0 : i32, i32
  }
  func.func @transform_2(%arg0: i32) -> (i32, i32) {
    %c0_i32 = arith.constant 0 : i32
    %c0_i32_0 = arith.constant 0 : i32
    return %arg0, %c0_i32 : i32, i32
  }
}

module attributes {stable_mosaic.version = 11 : i64} {
  func.func @_adj_support_kernel(%arg0: i32, %arg1: i32, %arg2: i32, %arg3: memref<256x512xf32, #tpu.memory_space<vmem>>, %arg4: memref<512x128xf32, #tpu.memory_space<vmem>>, %arg5: memref<256x128xf32, #tpu.memory_space<vmem>>, %arg6: memref<256x128xf32, #tpu.memory_space<vmem>>) attributes {dimension_semantics = [#tpu.dimension_semantics<parallel>, #tpu.dimension_semantics<parallel>, #tpu.dimension_semantics<arbitrary>], iteration_bounds = array<i64: 2, 1, 1>, scalar_prefetch = 0 : i64, scratch_operands = 1 : i64, tpu.core_type = #tpu.core_type<tc>, window_params = [{transform_indices = @transform_0, window_bounds = array<i64: 256, 512>}, {transform_indices = @transform_1, window_bounds = array<i64: 512, 128>}, {transform_indices = @transform_2, window_bounds = array<i64: 256, 128>}]} {
    %c0_i32 = arith.constant 0 : i32
    %0 = arith.cmpi eq, %arg2, %c0_i32 : i32
    %1 = arith.extui %0 : i1 to i32
    %c0_i32_0 = arith.constant 0 : i32
    %2 = arith.cmpi ne, %1, %c0_i32_0 : i32
    scf.if %2 {
      %cst_10 = arith.constant 0.000000e+00 : f32
      %12 = vector.broadcast %cst_10 : f32 to vector<256x128xf32>
      %c0_11 = arith.constant 0 : index
      %c0_12 = arith.constant 0 : index
      %13 = vector.load %arg6[%c0_11, %c0_12] : memref<256x128xf32, #tpu.memory_space<vmem>>, vector<256x128xf32>
      tpu.vector_store %arg6[%c0_11, %c0_12], %12 {strides = array<i32>} : memref<256x128xf32, #tpu.memory_space<vmem>>, vector<256x128xf32>,
    } else {
    }
    %c0 = arith.constant 0 : index
    %c0_1 = arith.constant 0 : index
    %3 = vector.load %arg6[%c0, %c0_1] : memref<256x128xf32, #tpu.memory_space<vmem>>, vector<256x128xf32>
    %c0_2 = arith.constant 0 : index
    %c0_3 = arith.constant 0 : index
    %4 = vector.load %arg3[%c0_2, %c0_3] : memref<256x512xf32, #tpu.memory_space<vmem>>, vector<256x512xf32>
    %c0_4 = arith.constant 0 : index
    %c0_5 = arith.constant 0 : index
    %5 = vector.load %arg4[%c0_4, %c0_5] : memref<512x128xf32, #tpu.memory_space<vmem>>, vector<512x128xf32>
    %cst = arith.constant dense<0.000000e+00> : vector<256x128xf32>
    %6 = tpu.matmul %4, %5, %cst {dimension_numbers = #tpu.dot_dimension_numbers<[1], [0], [0], [1], [0, 0, 1, 1], [], []>} : vector<256x512xf32>, vector<512x128xf32>, vector<256x128xf32> -> vector<256x128xf32>
    %7 = arith.addf %3, %6 : vector<256x128xf32>
    %c0_6 = arith.constant 0 : index
    %c0_7 = arith.constant 0 : index
    %8 = vector.load %arg6[%c0_6, %c0_7] : memref<256x128xf32, #tpu.memory_space<vmem>>, vector<256x128xf32>
    tpu.vector_store %arg6[%c0_6, %c0_7], %7 {strides = array<i32>} : memref<256x128xf32, #tpu.memory_space<vmem>>, vector<256x128xf32>,
    %c0_i32_8 = arith.constant 0 : i32
    %9 = arith.cmpi eq, %arg2, %c0_i32_8 : i32
    %10 = arith.extui %9 : i1 to i32
    %c0_i32_9 = arith.constant 0 : i32
    %11 = arith.cmpi ne, %10, %c0_i32_9 : i32
    scf.if %11 {
      %c0_10 = arith.constant 0 : index
      %c0_11 = arith.constant 0 : index
      %12 = vector.load %arg6[%c0_10, %c0_11] : memref<256x128xf32, #tpu.memory_space<vmem>>, vector<256x128xf32>
      %c0_12 = arith.constant 0 : index
      %c0_13 = arith.constant 0 : index
      %13 = vector.load %arg5[%c0_12, %c0_13] : memref<256x128xf32, #tpu.memory_space<vmem>>, vector<256x128xf32>
      tpu.vector_store %arg5[%c0_12, %c0_13], %12 {strides = array<i32>} : memref<256x128xf32, #tpu.memory_space<vmem>>, vector<256x128xf32>,
    } else {
    }
    return
  }
  func.func @transform_0(%arg0: i32, %arg1: i32, %arg2: i32) -> (i32, i32) {
    %c0_i32 = arith.constant 0 : i32
    return %arg0, %arg2 : i32, i32
  }
  func.func @transform_1(%arg0: i32, %arg1: i32, %arg2: i32) -> (i32, i32) {
    %c0_i32 = arith.constant 0 : i32
    return %arg2, %arg1 : i32, i32
  }
  func.func @transform_2(%arg0: i32, %arg1: i32, %arg2: i32) -> (i32, i32) {
    %c0_i32 = arith.constant 0 : i32
    return %arg0, %arg1 : i32, i32
  }
}

</mosaic_0001>

<bundles_post_ra>
// kernel: graph_convolution1_forward.2
= control target key start
LH: loop header
LB: loop body
LE: loop exit
PB: predicated region body
PF: predicated region fallthrough
CT: control target
= control target key end

     0   :  { %s1231_s1 = inlined_call_operand.vmem [shape: f32[128,128], index: 1, kind: input, shape index: {}]   ;;  %s1232_s0 = inlined_call_operand.vmem [shape: f32[512,128], index: 0, kind: input, shape index: {}]   ;;  %s1233_s2 = inlined_call_operand.vmem [shape: f32[512,128], index: 2, kind: output, shape index: {}]  }
   0x1   :  { %v90_v0 = vld [vmem:[%s1231_s1 + $0x78] sm:$0xff]  ;;  %v89_v1 = vld [vmem:[%s1231_s1 + $0x70] sm:$0xff]  ;;  %v88_v2 = vld [vmem:[%s1231_s1 + $0x68] sm:$0xff] }
   0x2   :  { %624 = vmatprep.subr.mxu0 %v90_v0  ;;  %752 = vmatprep.subr.mxu1 %v90_v0  ;;  %v87_v3 = vld [vmem:[%s1231_s1 + $0x60] sm:$0xff]  ;;  %v86_v4 = vld [vmem:[%s1231_s1 + $0x58] sm:$0xff]  ;;  %v85_v5 = vld [vmem:[%s1231_s1 + $0x50] sm:$0xff] }
   0x3   :  { %625 = vmatpush3.msra.mxu0 %v90_v0  ;;  %768 = vmatpush3.msra.mxu1 %v90_v0  ;;  %v84_v6 = vld [vmem:[%s1231_s1 + $0x48] sm:$0xff]  ;;  %v83_v7 = vld [vmem:[%s1231_s1 + $0x40] sm:$0xff]  ;;  %v82_v8 = vld [vmem:[%s1231_s1 + $0x38] sm:$0xff] }
   0x4   :  { %626 = vmatprep.subr.mxu0 %v89_v1  ;;  %753 = vmatprep.subr.mxu1 %v89_v1  ;;  %v81_v9 = vld [vmem:[%s1231_s1 + $0x30] sm:$0xff]  ;;  %v80_v10 = vld [vmem:[%s1231_s1 + $0x28] sm:$0xff]  ;;  %v79_v11 = vld [vmem:[%s1231_s1 + $0x20] sm:$0xff] }
   0x5   :  { %627 = vmatpush3.msra.mxu0 %v89_v1  ;;  %769 = vmatpush3.msra.mxu1 %v89_v1  ;;  %v78_v12 = vld [vmem:[%s1231_s1 + $0x18] sm:$0xff]  ;;  %v77_v13 = vld [vmem:[%s1231_s1 + $0x10] sm:$0xff]  ;;  %v76_v14 = vld [vmem:[%s1231_s1 + $0x8] sm:$0xff] }
   0x6   :  { %628 = vmatprep.subr.mxu0 %v88_v2  ;;  %754 = vmatprep.subr.mxu1 %v88_v2  ;;  %v75_v15 = vld [vmem:[%s1231_s1] sm:$0xff]  ;;  %v12_v18 = vld [vmem:[%s1232_s0 + $0x8] sm:$0xff]  ;;  %v13_v20 = vld [vmem:[%s1232_s0 + $0x10] sm:$0xff] }
   0x7   :  { %629 = vmatpush3.msra.mxu0 %v88_v2  ;;  %770 = vmatpush3.msra.mxu1 %v88_v2  ;;  %v11_v16 = vld [vmem:[%s1232_s0] sm:$0xff]  ;;  %v44_v19 = vld [vmem:[%s1232_s0 + $0x108] sm:$0xff]  ;;  %v45_v21 = vld [vmem:[%s1232_s0 + $0x110] sm:$0xff] }
   0x8   :  { %630 = vmatprep.subr.mxu0 %v87_v3  ;;  %755 = vmatprep.subr.mxu1 %v87_v3  ;;  %v43_v17 = vld [vmem:[%s1232_s0 + $0x100] sm:$0xff]  ;;  %v14_v22 = vld [vmem:[%s1232_s0 + $0x18] sm:$0xff]  ;;  %v16_v26 = vld [vmem:[%s1232_s0 + $0x28] sm:$0xff] }
   0x9   :  { %631 = vmatpush3.msra.mxu0 %v87_v3  ;;  %771 = vmatpush3.msra.mxu1 %v87_v3  ;;  %v46_v23 = vld [vmem:[%s1232_s0 + $0x118] sm:$0xff]  ;;  %v15_v24 = vld [vmem:[%s1232_s0 + $0x20] sm:$0xff]  ;;  %v48_v27 = vld [vmem:[%s1232_s0 + $0x128] sm:$0xff] }
   0xa   :  { %632 = vmatprep.subr.mxu0 %v86_v4  ;;  %756 = vmatprep.subr.mxu1 %v86_v4  ;;  %v47_v25 = vld [vmem:[%s1232_s0 + $0x120] sm:$0xff]  ;;  %v17_v28 = vld [vmem:[%s1232_s0 + $0x30] sm:$0xff]  ;;  %v18_v30 = vld [vmem:[%s1232_s0 + $0x38] sm:$0xff] }
   0xb   :  { %633 = vmatpush3.msra.mxu0 %v86_v4  ;;  %772 = vmatpush3.msra.mxu1 %v86_v4  ;;  %v49_v29 = vld [vmem:[%s1232_s0 + $0x130] sm:$0xff]  ;;  %v50_v31 = vld [vmem:[%s1232_s0 + $0x138] sm:$0xff]  ;;  %v19_v32 = vld [vmem:[%s1232_s0 + $0x40] sm:$0xff] }
   0xc   :  { %634 = vmatprep.subr.mxu0 %v85_v5  ;;  %757 = vmatprep.subr.mxu1 %v85_v5  ;;  %v51_v33 = vld [vmem:[%s1232_s0 + $0x140] sm:$0xff]  ;;  %v20_v34 = vld [vmem:[%s1232_s0 + $0x48] sm:$0xff]  ;;  %v21_v36 = vld [vmem:[%s1232_s0 + $0x50] sm:$0xff] }
   0xd   :  { %635 = vmatpush3.msra.mxu0 %v85_v5  ;;  %773 = vmatpush3.msra.mxu1 %v85_v5  ;;  %v52_v35 = vld [vmem:[%s1232_s0 + $0x148] sm:$0xff]  ;;  %v53_v37 = vld [vmem:[%s1232_s0 + $0x150] sm:$0xff]  ;;  %v22_v38 = vld [vmem:[%s1232_s0 + $0x58] sm:$0xff] }
   0xe   :  { %636 = vmatprep.subr.mxu0 %v84_v6  ;;  %758 = vmatprep.subr.mxu1 %v84_v6  ;;  %v54_v39 = vld [vmem:[%s1232_s0 + $0x158] sm:$0xff]  ;;  %v23_v40 = vld [vmem:[%s1232_s0 + $0x60] sm:$0xff]  ;;  %v24_v42 = vld [vmem:[%s1232_s0 + $0x68] sm:$0xff] }
   0xf   :  { %637 = vmatpush3.msra.mxu0 %v84_v6  ;;  %774 = vmatpush3.msra.mxu1 %v84_v6  ;;  %v55_v41 = vld [vmem:[%s1232_s0 + $0x160] sm:$0xff]  ;;  %v56_v43 = vld [vmem:[%s1232_s0 + $0x168] sm:$0xff]  ;;  %v25_v44 = vld [vmem:[%s1232_s0 + $0x70] sm:$0xff] }
  0x10   :  { %638 = vmatprep.subr.mxu0 %v83_v7  ;;  %759 = vmatprep.subr.mxu1 %v83_v7  ;;  %v57_v45 = vld [vmem:[%s1232_s0 + $0x170] sm:$0xff]  ;;  %v26_v46 = vld [vmem:[%s1232_s0 + $0x78] sm:$0xff]  ;;  %v27_v48 = vld [vmem:[%s1232_s0 + $0x80] sm:$0xff] }
  0x11   :  { %639 = vmatpush3.msra.mxu0 %v83_v7  ;;  %775 = vmatpush3.msra.mxu1 %v83_v7  ;;  %v58_v47 = vld [vmem:[%s1232_s0 + $0x178] sm:$0xff]  ;;  %v59_v49 = vld [vmem:[%s1232_s0 + $0x180] sm:$0xff]  ;;  %v28_v50 = vld [vmem:[%s1232_s0 + $0x88] sm:$0xff] }
  0x12   :  { %640 = vmatprep.subr.mxu0 %v82_v8  ;;  %760 = vmatprep.subr.mxu1 %v82_v8  ;;  %v60_v51 = vld [vmem:[%s1232_s0 + $0x188] sm:$0xff]  ;;  %v29_v52 = vld [vmem:[%s1232_s0 + $0x90] sm:$0xff]  ;;  %v30_v54 = vld [vmem:[%s1232_s0 + $0x98] sm:$0xff] }
  0x13   :  { %641 = vmatpush3.msra.mxu0 %v82_v8  ;;  %776 = vmatpush3.msra.mxu1 %v82_v8  ;;  %v61_v53 = vld [vmem:[%s1232_s0 + $0x190] sm:$0xff]  ;;  %v62_v55 = vld [vmem:[%s1232_s0 + $0x198] sm:$0xff]  ;;  %v31_v56 = vld [vmem:[%s1232_s0 + $0xa0] sm:$0xff] }
  0x14   :  { %642 = vmatprep.subr.mxu0 %v81_v9  ;;  %761 = vmatprep.subr.mxu1 %v81_v9  ;;  %v63_v57 = vld [vmem:[%s1232_s0 + $0x1a0] sm:$0xff]  ;;  %v32_v58 = vld [vmem:[%s1232_s0 + $0xa8] sm:$0xff]  ;;  %v33_v60 = vld [vmem:[%s1232_s0 + $0xb0] sm:$0xff] }
  0x15   :  { %643 = vmatpush3.msra.mxu0 %v81_v9  ;;  %777 = vmatpush3.msra.mxu1 %v81_v9  ;;  %v64_v59 = vld [vmem:[%s1232_s0 + $0x1a8] sm:$0xff]  ;;  %v65_v61 = vld [vmem:[%s1232_s0 + $0x1b0] sm:$0xff]  ;;  %v34_v62 = vld [vmem:[%s1232_s0 + $0xb8] sm:$0xff] }
  0x16   :  { %644 = vmatprep.subr.mxu0 %v80_v10  ;;  %762 = vmatprep.subr.mxu1 %v80_v10  ;;  %v66_v63 = vld [vmem:[%s1232_s0 + $0x1b8] sm:$0xff]  ;;  %v35_v0 = vld [vmem:[%s1232_s0 + $0xc0] sm:$0xff]  ;;  %v36_v2 = vld [vmem:[%s1232_s0 + $0xc8] sm:$0xff] }
  0x17   :  { %645 = vmatpush3.msra.mxu0 %v80_v10  ;;  %778 = vmatpush3.msra.mxu1 %v80_v10  ;;  %v67_v1 = vld [vmem:[%s1232_s0 + $0x1c0] sm:$0xff]  ;;  %v68_v3 = vld [vmem:[%s1232_s0 + $0x1c8] sm:$0xff]  ;;  %v37_v4 = vld [vmem:[%s1232_s0 + $0xd0] sm:$0xff] }
  0x18   :  { %646 = vmatprep.subr.mxu0 %v79_v11  ;;  %763 = vmatprep.subr.mxu1 %v79_v11  ;;  %v69_v5 = vld [vmem:[%s1232_s0 + $0x1d0] sm:$0xff]  ;;  %v38_v6 = vld [vmem:[%s1232_s0 + $0xd8] sm:$0xff]  ;;  %v39_v8 = vld [vmem:[%s1232_s0 + $0xe0] sm:$0xff] }
  0x19   :  { %647 = vmatpush3.msra.mxu0 %v79_v11  ;;  %779 = vmatpush3.msra.mxu1 %v79_v11  ;;  %v70_v7 = vld [vmem:[%s1232_s0 + $0x1d8] sm:$0xff]  ;;  %v71_v9 = vld [vmem:[%s1232_s0 + $0x1e0] sm:$0xff]  ;;  %v40_v10 = vld [vmem:[%s1232_s0 + $0xe8] sm:$0xff] }
  0x1a   :  { %648 = vmatprep.subr.mxu0 %v78_v12  ;;  %764 = vmatprep.subr.mxu1 %v78_v12  ;;  %v72_v11 = vld [vmem:[%s1232_s0 + $0x1e8] sm:$0xff] }
  0x1b   :  { %649 = vmatpush3.msra.mxu0 %v78_v12  ;;  %780 = vmatpush3.msra.mxu1 %v78_v12  ;;  %v41_v12 = vld [vmem:[%s1232_s0 + $0xf0] sm:$0xff] }
  0x1c   :  { %650 = vmatprep.subr.mxu0 %v77_v13  ;;  %765 = vmatprep.subr.mxu1 %v77_v13 }
  0x1d   :  { %651 = vmatpush3.msra.mxu0 %v77_v13  ;;  %781 = vmatpush3.msra.mxu1 %v77_v13  ;;  %v73_v13 = vld [vmem:[%s1232_s0 + $0x1f0] sm:$0xff] }
  0x1e   :  { %652 = vmatprep.subr.mxu0 %v76_v14  ;;  %766 = vmatprep.subr.mxu1 %v76_v14 }
  0x1f   :  { %653 = vmatpush3.msra.mxu0 %v76_v14  ;;  %782 = vmatpush3.msra.mxu1 %v76_v14  ;;  %v42_v14 = vld [vmem:[%s1232_s0 + $0xf8] sm:$0xff] }
  0x20   :  { %654 = vmatprep.subr.mxu0 %v75_v15  ;;  %767 = vmatprep.subr.mxu1 %v75_v15 }
  0x21   :  { %655 = vmatpush3.msra.mxu0 %v75_v15  ;;  %783 = vmatpush3.msra.mxu1 %v75_v15  ;;  %v74_v15 = vld [vmem:[%s1232_s0 + $0x1f8] sm:$0xff] }
  0x22   :  { %656 = vmatprep.mubr.f32.mxu0 %v11_v16  ;;  %704 = vmatprep.mubr.f32.mxu1 %v43_v17 }
  0x23   :  { %657 = vmatmul.mubr.f32.vlgmr.msra.gmra.mxu0 %v12_v18  ;;  %705 = vmatmul.mubr.f32.vlgmr.msra.gmra.mxu1 %v44_v19 }
  0x24   :  { %659 = vmatprep.mubr.f32.mxu0 %v13_v20  ;;  %707 = vmatprep.mubr.f32.mxu1 %v45_v21 }
  0x27   :  { %660 = vmatmul.mubr.f32.gmra.mxu0 %v14_v22  ;;  %708 = vmatmul.mubr.f32.gmra.mxu1 %v46_v23 }
  0x28   :  { %662 = vmatprep.mubr.f32.mxu0 %v15_v24  ;;  %710 = vmatprep.mubr.f32.mxu1 %v47_v25 }
  0x2b   :  { %663 = vmatmul.mubr.f32.gmra.mxu0 %v16_v26  ;;  %711 = vmatmul.mubr.f32.gmra.mxu1 %v48_v27 }
  0x2c   :  { %665 = vmatprep.mubr.f32.mxu0 %v17_v28  ;;  %713 = vmatprep.mubr.f32.mxu1 %v49_v29 }
  0x2f   :  { %666 = vmatmul.mubr.f32.gmra.mxu0 %v18_v30  ;;  %714 = vmatmul.mubr.f32.gmra.mxu1 %v50_v31 }
  0x30   :  { %668 = vmatprep.mubr.f32.mxu0 %v19_v32  ;;  %716 = vmatprep.mubr.f32.mxu1 %v51_v33 }
  0x33   :  { %669 = vmatmul.mubr.f32.gmra.mxu0 %v20_v34  ;;  %717 = vmatmul.mubr.f32.gmra.mxu1 %v52_v35 }
  0x34   :  { %671 = vmatprep.mubr.f32.mxu0 %v21_v36  ;;  %719 = vmatprep.mubr.f32.mxu1 %v53_v37 }
  0x37   :  { %672 = vmatmul.mubr.f32.gmra.mxu0 %v22_v38  ;;  %720 = vmatmul.mubr.f32.gmra.mxu1 %v54_v39 }
  0x38   :  { %674 = vmatprep.mubr.f32.mxu0 %v23_v40  ;;  %722 = vmatprep.mubr.f32.mxu1 %v55_v41 }
  0x3b   :  { %675 = vmatmul.mubr.f32.gmra.mxu0 %v24_v42  ;;  %723 = vmatmul.mubr.f32.gmra.mxu1 %v56_v43 }
  0x3c   :  { %677 = vmatprep.mubr.f32.mxu0 %v25_v44  ;;  %725 = vmatprep.mubr.f32.mxu1 %v57_v45 }
  0x3f   :  { %678 = vmatmul.mubr.f32.gmra.mxu0 %v26_v46  ;;  %726 = vmatmul.mubr.f32.gmra.mxu1 %v58_v47 }
  0x40   :  { %680 = vmatprep.mubr.f32.mxu0 %v27_v48  ;;  %728 = vmatprep.mubr.f32.mxu1 %v59_v49 }
  0x43   :  { %681 = vmatmul.mubr.f32.gmra.mxu0 %v28_v50  ;;  %729 = vmatmul.mubr.f32.gmra.mxu1 %v60_v51 }
  0x44   :  { %683 = vmatprep.mubr.f32.mxu0 %v29_v52  ;;  %731 = vmatprep.mubr.f32.mxu1 %v61_v53 }
  0x47   :  { %684 = vmatmul.mubr.f32.gmra.mxu0 %v30_v54  ;;  %732 = vmatmul.mubr.f32.gmra.mxu1 %v62_v55 }
  0x48   :  { %686 = vmatprep.mubr.f32.mxu0 %v31_v56  ;;  %734 = vmatprep.mubr.f32.mxu1 %v63_v57 }
  0x4b   :  { %687 = vmatmul.mubr.f32.gmra.mxu0 %v32_v58  ;;  %735 = vmatmul.mubr.f32.gmra.mxu1 %v64_v59 }
  0x4c   :  { %689 = vmatprep.mubr.f32.mxu0 %v33_v60  ;;  %737 = vmatprep.mubr.f32.mxu1 %v65_v61 }
  0x4f   :  { %690 = vmatmul.mubr.f32.gmra.mxu0 %v34_v62  ;;  %738 = vmatmul.mubr.f32.gmra.mxu1 %v66_v63 }
  0x50   :  { %692 = vmatprep.mubr.f32.mxu0 %v35_v0  ;;  %740 = vmatprep.mubr.f32.mxu1 %v67_v1 }
  0x53   :  { %693 = vmatmul.mubr.f32.gmra.mxu0 %v36_v2  ;;  %741 = vmatmul.mubr.f32.gmra.mxu1 %v68_v3 }
  0x54   :  { %695 = vmatprep.mubr.f32.mxu0 %v37_v4  ;;  %743 = vmatprep.mubr.f32.mxu1 %v69_v5 }
  0x57   :  { %696 = vmatmul.mubr.f32.gmra.mxu0 %v38_v6  ;;  %744 = vmatmul.mubr.f32.gmra.mxu1 %v70_v7 }
  0x58   :  { %698 = vmatprep.mubr.f32.mxu0 %v39_v8  ;;  %746 = vmatprep.mubr.f32.mxu1 %v71_v9 }
  0x5b   :  { %699 = vmatmul.mubr.f32.gmra.mxu0 %v40_v10  ;;  %747 = vmatmul.mubr.f32.gmra.mxu1 %v72_v11 }
  0x5c   :  { %701 = vmatprep.mubr.f32.mxu0 %v41_v12  ;;  %749 = vmatprep.mubr.f32.mxu1 %v73_v13 }
  0x5f   :  { %702 = vmatmul.mubr.f32.gmra.mxu0 %v42_v14  ;;  %750 = vmatmul.mubr.f32.gmra.mxu1 %v74_v15 }
  0xe3   :  { %v658_v16 = vpop.f32.mrf.mxu0  ;;  %v706_v17 = vpop.f32.mrf.mxu1 }
  0xe4   :  { %477 = vst [vmem:[%s1233_s2 + $0x8] sm:$0xff] %v658_v16  ;;  %509 = vst [vmem:[%s1233_s2 + $0x108] sm:$0xff] %v706_v17 }
  0xe5   :  { %v157_v18 = vpop.f32.mrf.mxu0  ;;  %v317_v19 = vpop.f32.mrf.mxu1 }
  0xe6   :  { %476 = vst [vmem:[%s1233_s2] sm:$0xff] %v157_v18  ;;  %508 = vst [vmem:[%s1233_s2 + $0x100] sm:$0xff] %v317_v19 }
  0xe7   :  { %v661_v20 = vpop.f32.mrf.mxu0  ;;  %v709_v21 = vpop.f32.mrf.mxu1 }
  0xe8   :  { %479 = vst [vmem:[%s1233_s2 + $0x18] sm:$0xff] %v661_v20  ;;  %511 = vst [vmem:[%s1233_s2 + $0x118] sm:$0xff] %v709_v21 }
  0xe9   :  { %v167_v22 = vpop.f32.mrf.mxu0  ;;  %v327_v23 = vpop.f32.mrf.mxu1 }
  0xea   :  { %478 = vst [vmem:[%s1233_s2 + $0x10] sm:$0xff] %v167_v22  ;;  %510 = vst [vmem:[%s1233_s2 + $0x110] sm:$0xff] %v327_v23 }
  0xeb   :  { %v664_v24 = vpop.f32.mrf.mxu0  ;;  %v712_v25 = vpop.f32.mrf.mxu1 }
  0xec   :  { %481 = vst [vmem:[%s1233_s2 + $0x28] sm:$0xff] %v664_v24  ;;  %513 = vst [vmem:[%s1233_s2 + $0x128] sm:$0xff] %v712_v25 }
  0xed   :  { %v177_v26 = vpop.f32.mrf.mxu0  ;;  %v337_v27 = vpop.f32.mrf.mxu1 }
  0xee   :  { %480 = vst [vmem:[%s1233_s2 + $0x20] sm:$0xff] %v177_v26  ;;  %512 = vst [vmem:[%s1233_s2 + $0x120] sm:$0xff] %v337_v27 }
  0xef   :  { %v667_v28 = vpop.f32.mrf.mxu0  ;;  %v715_v29 = vpop.f32.mrf.mxu1 }
  0xf0   :  { %483 = vst [vmem:[%s1233_s2 + $0x38] sm:$0xff] %v667_v28  ;;  %515 = vst [vmem:[%s1233_s2 + $0x138] sm:$0xff] %v715_v29 }
  0xf1   :  { %v187_v30 = vpop.f32.mrf.mxu0  ;;  %v347_v31 = vpop.f32.mrf.mxu1 }
  0xf2   :  { %482 = vst [vmem:[%s1233_s2 + $0x30] sm:$0xff] %v187_v30  ;;  %514 = vst [vmem:[%s1233_s2 + $0x130] sm:$0xff] %v347_v31 }
  0xf3   :  { %v670_v32 = vpop.f32.mrf.mxu0  ;;  %v718_v33 = vpop.f32.mrf.mxu1 }
  0xf4   :  { %485 = vst [vmem:[%s1233_s2 + $0x48] sm:$0xff] %v670_v32  ;;  %517 = vst [vmem:[%s1233_s2 + $0x148] sm:$0xff] %v718_v33 }
  0xf5   :  { %v197_v34 = vpop.f32.mrf.mxu0  ;;  %v357_v35 = vpop.f32.mrf.mxu1 }
  0xf6   :  { %484 = vst [vmem:[%s1233_s2 + $0x40] sm:$0xff] %v197_v34  ;;  %516 = vst [vmem:[%s1233_s2 + $0x140] sm:$0xff] %v357_v35 }
  0xf7   :  { %v673_v36 = vpop.f32.mrf.mxu0  ;;  %v721_v37 = vpop.f32.mrf.mxu1 }
  0xf8   :  { %487 = vst [vmem:[%s1233_s2 + $0x58] sm:$0xff] %v673_v36  ;;  %519 = vst [vmem:[%s1233_s2 + $0x158] sm:$0xff] %v721_v37 }
  0xf9   :  { %v207_v38 = vpop.f32.mrf.mxu0  ;;  %v367_v39 = vpop.f32.mrf.mxu1 }
  0xfa   :  { %486 = vst [vmem:[%s1233_s2 + $0x50] sm:$0xff] %v207_v38  ;;  %518 = vst [vmem:[%s1233_s2 + $0x150] sm:$0xff] %v367_v39 }
  0xfb   :  { %v676_v40 = vpop.f32.mrf.mxu0  ;;  %v724_v41 = vpop.f32.mrf.mxu1 }
  0xfc   :  { %489 = vst [vmem:[%s1233_s2 + $0x68] sm:$0xff] %v676_v40  ;;  %521 = vst [vmem:[%s1233_s2 + $0x168] sm:$0xff] %v724_v41 }
  0xfd   :  { %v217_v42 = vpop.f32.mrf.mxu0  ;;  %v377_v43 = vpop.f32.mrf.mxu1 }
  0xfe   :  { %488 = vst [vmem:[%s1233_s2 + $0x60] sm:$0xff] %v217_v42  ;;  %520 = vst [vmem:[%s1233_s2 + $0x160] sm:$0xff] %v377_v43 }
  0xff   :  { %v679_v44 = vpop.f32.mrf.mxu0  ;;  %v727_v45 = vpop.f32.mrf.mxu1 }
 0x100   :  { %491 = vst [vmem:[%s1233_s2 + $0x78] sm:$0xff] %v679_v44  ;;  %523 = vst [vmem:[%s1233_s2 + $0x178] sm:$0xff] %v727_v45 }
 0x101   :  { %v227_v46 = vpop.f32.mrf.mxu0  ;;  %v387_v47 = vpop.f32.mrf.mxu1 }
 0x102   :  { %490 = vst [vmem:[%s1233_s2 + $0x70] sm:$0xff] %v227_v46  ;;  %522 = vst [vmem:[%s1233_s2 + $0x170] sm:$0xff] %v387_v47 }
 0x103   :  { %v682_v48 = vpop.f32.mrf.mxu0  ;;  %v730_v49 = vpop.f32.mrf.mxu1 }
 0x104   :  { %493 = vst [vmem:[%s1233_s2 + $0x88] sm:$0xff] %v682_v48  ;;  %525 = vst [vmem:[%s1233_s2 + $0x188] sm:$0xff] %v730_v49 }
 0x105   :  { %v237_v50 = vpop.f32.mrf.mxu0  ;;  %v397_v51 = vpop.f32.mrf.mxu1 }
 0x106   :  { %492 = vst [vmem:[%s1233_s2 + $0x80] sm:$0xff] %v237_v50  ;;  %524 = vst [vmem:[%s1233_s2 + $0x180] sm:$0xff] %v397_v51 }
 0x107   :  { %v685_v52 = vpop.f32.mrf.mxu0  ;;  %v733_v53 = vpop.f32.mrf.mxu1 }
 0x108   :  { %495 = vst [vmem:[%s1233_s2 + $0x98] sm:$0xff] %v685_v52  ;;  %527 = vst [vmem:[%s1233_s2 + $0x198] sm:$0xff] %v733_v53 }
 0x109   :  { %v247_v54 = vpop.f32.mrf.mxu0  ;;  %v407_v55 = vpop.f32.mrf.mxu1 }
 0x10a   :  { %494 = vst [vmem:[%s1233_s2 + $0x90] sm:$0xff] %v247_v54  ;;  %526 = vst [vmem:[%s1233_s2 + $0x190] sm:$0xff] %v407_v55 }
 0x10b   :  { %v688_v56 = vpop.f32.mrf.mxu0  ;;  %v736_v57 = vpop.f32.mrf.mxu1 }
 0x10c   :  { %497 = vst [vmem:[%s1233_s2 + $0xa8] sm:$0xff] %v688_v56  ;;  %529 = vst [vmem:[%s1233_s2 + $0x1a8] sm:$0xff] %v736_v57 }
 0x10d   :  { %v257_v58 = vpop.f32.mrf.mxu0  ;;  %v417_v59 = vpop.f32.mrf.mxu1 }
 0x10e   :  { %496 = vst [vmem:[%s1233_s2 + $0xa0] sm:$0xff] %v257_v58  ;;  %528 = vst [vmem:[%s1233_s2 + $0x1a0] sm:$0xff] %v417_v59 }
 0x10f   :  { %v691_v60 = vpop.f32.mrf.mxu0  ;;  %v739_v61 = vpop.f32.mrf.mxu1 }
 0x110   :  { %499 = vst [vmem:[%s1233_s2 + $0xb8] sm:$0xff] %v691_v60  ;;  %531 = vst [vmem:[%s1233_s2 + $0x1b8] sm:$0xff] %v739_v61 }
 0x111   :  { %v267_v62 = vpop.f32.mrf.mxu0  ;;  %v427_v63 = vpop.f32.mrf.mxu1 }
 0x112   :  { %498 = vst [vmem:[%s1233_s2 + $0xb0] sm:$0xff] %v267_v62  ;;  %530 = vst [vmem:[%s1233_s2 + $0x1b0] sm:$0xff] %v427_v63 }
 0x113   :  { %v694_v0 = vpop.f32.mrf.mxu0  ;;  %v742_v1 = vpop.f32.mrf.mxu1 }
 0x114   :  { %501 = vst [vmem:[%s1233_s2 + $0xc8] sm:$0xff] %v694_v0  ;;  %533 = vst [vmem:[%s1233_s2 + $0x1c8] sm:$0xff] %v742_v1 }
 0x115   :  { %v277_v2 = vpop.f32.mrf.mxu0  ;;  %v437_v3 = vpop.f32.mrf.mxu1 }
 0x116   :  { %500 = vst [vmem:[%s1233_s2 + $0xc0] sm:$0xff] %v277_v2  ;;  %532 = vst [vmem:[%s1233_s2 + $0x1c0] sm:$0xff] %v437_v3 }
 0x117   :  { %v697_v4 = vpop.f32.mrf.mxu0  ;;  %v745_v5 = vpop.f32.mrf.mxu1 }
 0x118   :  { %503 = vst [vmem:[%s1233_s2 + $0xd8] sm:$0xff] %v697_v4  ;;  %535 = vst [vmem:[%s1233_s2 + $0x1d8] sm:$0xff] %v745_v5 }
 0x119   :  { %v287_v6 = vpop.f32.mrf.mxu0  ;;  %v447_v7 = vpop.f32.mrf.mxu1 }
 0x11a   :  { %502 = vst [vmem:[%s1233_s2 + $0xd0] sm:$0xff] %v287_v6  ;;  %534 = vst [vmem:[%s1233_s2 + $0x1d0] sm:$0xff] %v447_v7 }
 0x11b   :  { %v700_v8 = vpop.f32.mrf.mxu0  ;;  %v748_v9 = vpop.f32.mrf.mxu1 }
 0x11c   :  { %505 = vst [vmem:[%s1233_s2 + $0xe8] sm:$0xff] %v700_v8  ;;  %537 = vst [vmem:[%s1233_s2 + $0x1e8] sm:$0xff] %v748_v9 }
 0x11d   :  { %v297_v10 = vpop.f32.mrf.mxu0  ;;  %v457_v11 = vpop.f32.mrf.mxu1 }
 0x11e   :  { %504 = vst [vmem:[%s1233_s2 + $0xe0] sm:$0xff] %v297_v10  ;;  %536 = vst [vmem:[%s1233_s2 + $0x1e0] sm:$0xff] %v457_v11 }
 0x11f   :  { %v703_v12 = vpop.f32.mrf.mxu0  ;;  %v751_v13 = vpop.f32.mrf.mxu1 }
 0x120   :  { %507 = vst [vmem:[%s1233_s2 + $0xf8] sm:$0xff] %v703_v12  ;;  %539 = vst [vmem:[%s1233_s2 + $0x1f8] sm:$0xff] %v751_v13 }
 0x121   :  { %v307_v14 = vpop.f32.mrf.mxu0  ;;  %v467_v15 = vpop.f32.mrf.mxu1 }
 0x122   :  { %506 = vst [vmem:[%s1233_s2 + $0xf0] sm:$0xff] %v307_v14  ;;  %538 = vst [vmem:[%s1233_s2 + $0x1f0] sm:$0xff] %v467_v15 }

// kernel: graph_convolution1_forward.3
= control target key start
LH: loop header
LB: loop body
LE: loop exit
PB: predicated region body
PF: predicated region fallthrough
CT: control target
= control target key end

     0   :  { %s1248_s9 = smov 0   ;;  %s1250_s10 = smov 0   ;;  %s1708_s0 = inlined_call_operand.vmem [shape: f32[512,512], index: 0, kind: input, shape index: {}]   ;;  %s1709_s1 = inlined_call_operand.vmem [shape: f32[512,128], index: 1, kind: input, shape index: {}]   ;;  %s1710_s2 = inlined_call_operand.vmem [shape: f32[512,128], index: 2, kind: output, shape index: {}]  }
   0x1   :  { %s1252_s11 = smov 0  }
   0x2 LB: > { %s31_s12 = sadd.s32 1, %s1226_s10  ;;  %p1174_p0 = scmp.ge.s32.totalorder %s1230_s11, 1  ;;  %s1230_s11 = sphi %s1252_s11, %s12_s11   ;;  %s1226_s10 = sphi %s1250_s10, %s1712_s10   ;;  %s1222_s9 = sphi %s1248_s9, %s1711_s9  }
   0x3   : > { %p33_p1 = scmp.ge.s32.totalorder %s31_s12, 2  ;;  %p158_p2 = scmp.lt.s32.totalorder %s1230_s11, 3 }
   0x5   : > { %s1714_s12 = smov (%p33_p1, %s31_s12), 0  ;;  %p159_p3 = pnand %p1174_p0, %p158_p2 }
   0x6   : > { %s1175_s5 = sshll.u32 (!%p159_p3), %s1222_s9, 5 }
   0x7   : > { %162 = sbr.rel (%p159_p3) target bundleno = 398 (0x18e), region = 28  ;;  %p198_p4 = scmp.lt.s32.totalorder (!%p159_p3), %s1175_s5, 63 }
   0xc   : > { %v437_v0 = vld [vmem:[%s1709_s1 + $0x78] sm:$0xff]  ;;  %v1232_v2 = vmov 0.0   ;;  %v436_v3 = vld [vmem:[%s1709_s1 + $0x70] sm:$0xff]  ;;  %v435_v5 = vld [vmem:[%s1709_s1 + $0x68] sm:$0xff]  ;;  %s1716_s5 = smov (!%p198_p4, %s1175_s5), 63 }
   0xd   : > { %v469_v1 = vld [vmem:[%s1709_s1 + $0x178] sm:$0xff]  ;;  %486 = vmatprep.subr.mxu0 %v1232_v2  ;;  %711 = vmatprep.subr.mxu1 %v1232_v2  ;;  %v468_v4 = vld [vmem:[%s1709_s1 + $0x170] sm:$0xff]  ;;  %v467_v6 = vld [vmem:[%s1709_s1 + $0x168] sm:$0xff]  ;;  %s1182_s6 = sshll.u32 %s1716_s5, 5  ;;  %s1179_s25 = sshll.u32 %s1716_s5, 3 }
   0xe   : > { %487 = vmatpush1.msra.mxu0 %v437_v0  ;;  %712 = vmatpush1.msra.mxu1 %v469_v1  ;;  %v434_v7 = vld [vmem:[%s1709_s1 + $0x60] sm:$0xff]  ;;  %v433_v9 = vld [vmem:[%s1709_s1 + $0x58] sm:$0xff]  ;;  %v432_v11 = vld [vmem:[%s1709_s1 + $0x50] sm:$0xff]  ;;  %s1513_s16 = scalar_lea.vmem %s1708_s0, %s1182_s6  ;;  %s1665_s28 = scalar_lea.vmem %s1710_s2, %s1179_s25 }
   0xf   : > { %488 = vmatprep.subr.mxu0 %v1232_v2  ;;  %713 = vmatprep.subr.mxu1 %v1232_v2  ;;  %v466_v8 = vld [vmem:[%s1709_s1 + $0x160] sm:$0xff]  ;;  %v465_v10 = vld [vmem:[%s1709_s1 + $0x158] sm:$0xff]  ;;  %v464_v12 = vld [vmem:[%s1709_s1 + $0x150] sm:$0xff] }
  0x10   : > { %489 = vmatpush1.msra.mxu0 %v436_v3  ;;  %714 = vmatpush1.msra.mxu1 %v468_v4  ;;  %v431_v13 = vld [vmem:[%s1709_s1 + $0x48] sm:$0xff]  ;;  %v430_v15 = vld [vmem:[%s1709_s1 + $0x40] sm:$0xff]  ;;  %v429_v17 = vld [vmem:[%s1709_s1 + $0x38] sm:$0xff] }
  0x11   : > { %490 = vmatprep.subr.mxu0 %v1232_v2  ;;  %715 = vmatprep.subr.mxu1 %v1232_v2  ;;  %v463_v14 = vld [vmem:[%s1709_s1 + $0x148] sm:$0xff]  ;;  %v462_v16 = vld [vmem:[%s1709_s1 + $0x140] sm:$0xff]  ;;  %v461_v18 = vld [vmem:[%s1709_s1 + $0x138] sm:$0xff] }
  0x12   : > { %491 = vmatpush1.msra.mxu0 %v435_v5  ;;  %716 = vmatpush1.msra.mxu1 %v467_v6  ;;  %v428_v19 = vld [vmem:[%s1709_s1 + $0x30] sm:$0xff]  ;;  %v427_v21 = vld [vmem:[%s1709_s1 + $0x28] sm:$0xff]  ;;  %v426_v23 = vld [vmem:[%s1709_s1 + $0x20] sm:$0xff] }
  0x13   : > { %492 = vmatprep.subr.mxu0 %v1232_v2  ;;  %717 = vmatprep.subr.mxu1 %v1232_v2  ;;  %v460_v20 = vld [vmem:[%s1709_s1 + $0x130] sm:$0xff]  ;;  %v459_v22 = vld [vmem:[%s1709_s1 + $0x128] sm:$0xff]  ;;  %v458_v24 = vld [vmem:[%s1709_s1 + $0x120] sm:$0xff] }
  0x14   : > { %493 = vmatpush1.msra.mxu0 %v434_v7  ;;  %718 = vmatpush1.msra.mxu1 %v466_v8  ;;  %v425_v25 = vld [vmem:[%s1709_s1 + $0x18] sm:$0xff]  ;;  %v424_v27 = vld [vmem:[%s1709_s1 + $0x10] sm:$0xff]  ;;  %v423_v29 = vld [vmem:[%s1709_s1 + $0x8] sm:$0xff] }
  0x15   : > { %494 = vmatprep.subr.mxu0 %v1232_v2  ;;  %719 = vmatprep.subr.mxu1 %v1232_v2  ;;  %v457_v26 = vld [vmem:[%s1709_s1 + $0x118] sm:$0xff]  ;;  %v456_v28 = vld [vmem:[%s1709_s1 + $0x110] sm:$0xff]  ;;  %v455_v30 = vld [vmem:[%s1709_s1 + $0x108] sm:$0xff] }
  0x16   : > { %495 = vmatpush1.msra.mxu0 %v433_v9  ;;  %720 = vmatpush1.msra.mxu1 %v465_v10  ;;  %v422_v31 = vld [vmem:[%s1709_s1] sm:$0xff]  ;;  %v453_v33 = vld [vmem:[%s1709_s1 + $0xf8] sm:$0xff]  ;;  %v452_v35 = vld [vmem:[%s1709_s1 + $0xf0] sm:$0xff] }
  0x17   : > { %496 = vmatprep.subr.mxu0 %v1232_v2  ;;  %721 = vmatprep.subr.mxu1 %v1232_v2  ;;  %v454_v32 = vld [vmem:[%s1709_s1 + $0x100] sm:$0xff]  ;;  %v485_v34 = vld [vmem:[%s1709_s1 + $0x1f8] sm:$0xff]  ;;  %v484_v36 = vld [vmem:[%s1709_s1 + $0x1f0] sm:$0xff] }
  0x18   : > { %497 = vmatpush1.msra.mxu0 %v432_v11  ;;  %722 = vmatpush1.msra.mxu1 %v464_v12  ;;  %v451_v37 = vld [vmem:[%s1709_s1 + $0xe8] sm:$0xff]  ;;  %v450_v39 = vld [vmem:[%s1709_s1 + $0xe0] sm:$0xff]  ;;  %v449_v41 = vld [vmem:[%s1709_s1 + $0xd8] sm:$0xff] }
  0x19   : > { %498 = vmatprep.subr.mxu0 %v1232_v2  ;;  %723 = vmatprep.subr.mxu1 %v1232_v2  ;;  %v483_v38 = vld [vmem:[%s1709_s1 + $0x1e8] sm:$0xff]  ;;  %v482_v40 = vld [vmem:[%s1709_s1 + $0x1e0] sm:$0xff]  ;;  %v481_v42 = vld [vmem:[%s1709_s1 + $0x1d8] sm:$0xff] }
  0x1a   : > { %499 = vmatpush1.msra.mxu0 %v431_v13  ;;  %724 = vmatpush1.msra.mxu1 %v463_v14  ;;  %v448_v43 = vld [vmem:[%s1709_s1 + $0xd0] sm:$0xff]  ;;  %v447_v45 = vld [vmem:[%s1709_s1 + $0xc8] sm:$0xff]  ;;  %v446_v47 = vld [vmem:[%s1709_s1 + $0xc0] sm:$0xff] }
  0x1b   : > { %500 = vmatprep.subr.mxu0 %v1232_v2  ;;  %725 = vmatprep.subr.mxu1 %v1232_v2  ;;  %v480_v44 = vld [vmem:[%s1709_s1 + $0x1d0] sm:$0xff]  ;;  %v479_v46 = vld [vmem:[%s1709_s1 + $0x1c8] sm:$0xff]  ;;  %v478_v48 = vld [vmem:[%s1709_s1 + $0x1c0] sm:$0xff] }
  0x1c   : > { %501 = vmatpush1.msra.mxu0 %v430_v15  ;;  %726 = vmatpush1.msra.mxu1 %v462_v16  ;;  %v445_v49 = vld [vmem:[%s1709_s1 + $0xb8] sm:$0xff]  ;;  %v444_v51 = vld [vmem:[%s1709_s1 + $0xb0] sm:$0xff]  ;;  %v443_v53 = vld [vmem:[%s1709_s1 + $0xa8] sm:$0xff] }
  0x1d   : > { %502 = vmatprep.subr.mxu0 %v1232_v2  ;;  %727 = vmatprep.subr.mxu1 %v1232_v2  ;;  %v477_v50 = vld [vmem:[%s1709_s1 + $0x1b8] sm:$0xff]  ;;  %v476_v52 = vld [vmem:[%s1709_s1 + $0x1b0] sm:$0xff]  ;;  %v475_v54 = vld [vmem:[%s1709_s1 + $0x1a8] sm:$0xff] }
  0x1e   : > { %503 = vmatpush1.msra.mxu0 %v429_v17  ;;  %728 = vmatpush1.msra.mxu1 %v461_v18  ;;  %v442_v55 = vld [vmem:[%s1709_s1 + $0xa0] sm:$0xff]  ;;  %v441_v57 = vld [vmem:[%s1709_s1 + $0x98] sm:$0xff]  ;;  %v440_v59 = vld [vmem:[%s1709_s1 + $0x90] sm:$0xff] }
  0x1f   : > { %504 = vmatprep.subr.mxu0 %v1232_v2  ;;  %729 = vmatprep.subr.mxu1 %v1232_v2  ;;  %v474_v56 = vld [vmem:[%s1709_s1 + $0x1a0] sm:$0xff]  ;;  %v473_v58 = vld [vmem:[%s1709_s1 + $0x198] sm:$0xff]  ;;  %v472_v60 = vld [vmem:[%s1709_s1 + $0x190] sm:$0xff] }
  0x20   : > { %505 = vmatpush1.msra.mxu0 %v428_v19  ;;  %730 = vmatpush1.msra.mxu1 %v460_v20  ;;  %v439_v61 = vld [vmem:[%s1709_s1 + $0x88] sm:$0xff]  ;;  %v438_v63 = vld [vmem:[%s1709_s1 + $0x80] sm:$0xff]  ;;  %v297_v3 = vld [vmem:[%s1513_s16 + $0x18] sm:$0xff] }
  0x21   : > { %506 = vmatprep.subr.mxu0 %v1232_v2  ;;  %731 = vmatprep.subr.mxu1 %v1232_v2  ;;  %v471_v62 = vld [vmem:[%s1709_s1 + $0x188] sm:$0xff]  ;;  %v470_v1 = vld [vmem:[%s1709_s1 + $0x180] sm:$0xff]  ;;  %v296_v5 = vld [vmem:[%s1513_s16 + $0x10] sm:$0xff] }
  0x22   : > { %507 = vmatpush1.msra.mxu0 %v427_v21  ;;  %732 = vmatpush1.msra.mxu1 %v459_v22  ;;  %v295_v0 = vld [vmem:[%s1513_s16 + $0x8] sm:$0xff]  ;;  %v294_v4 = vld [vmem:[%s1513_s16] sm:$0xff]  ;;  %v301_v7 = vld [vmem:[%s1513_s16 + $0x38] sm:$0xff] }
  0x23   : > { %508 = vmatprep.subr.mxu0 %v1232_v2  ;;  %733 = vmatprep.subr.mxu1 %v1232_v2  ;;  %v299_v6 = vld [vmem:[%s1513_s16 + $0x28] sm:$0xff]  ;;  %v298_v8 = vld [vmem:[%s1513_s16 + $0x20] sm:$0xff]  ;;  %v305_v10 = vld [vmem:[%s1513_s16 + $0x58] sm:$0xff] }
  0x24   : > { %509 = vmatpush1.msra.mxu0 %v426_v23  ;;  %734 = vmatpush1.msra.mxu1 %v458_v24  ;;  %v303_v9 = vld [vmem:[%s1513_s16 + $0x48] sm:$0xff]  ;;  %v302_v11 = vld [vmem:[%s1513_s16 + $0x40] sm:$0xff]  ;;  %v304_v12 = vld [vmem:[%s1513_s16 + $0x50] sm:$0xff] }
  0x25   : > { %510 = vmatprep.subr.mxu0 %v1232_v2  ;;  %735 = vmatprep.subr.mxu1 %v1232_v2  ;;  %v307_v13 = vld [vmem:[%s1513_s16 + $0x68] sm:$0xff]  ;;  %v309_v14 = vld [vmem:[%s1513_s16 + $0x78] sm:$0xff]  ;;  %v306_v15 = vld [vmem:[%s1513_s16 + $0x60] sm:$0xff] }
  0x26   : > { %511 = vmatpush1.msra.mxu0 %v425_v25  ;;  %736 = vmatpush1.msra.mxu1 %v457_v26  ;;  %v308_v16 = vld [vmem:[%s1513_s16 + $0x70] sm:$0xff]  ;;  %v311_v17 = vld [vmem:[%s1513_s16 + $0x88] sm:$0xff]  ;;  %v313_v18 = vld [vmem:[%s1513_s16 + $0x98] sm:$0xff] }
  0x27   : > { %512 = vmatprep.subr.mxu0 %v1232_v2  ;;  %737 = vmatprep.subr.mxu1 %v1232_v2  ;;  %v310_v19 = vld [vmem:[%s1513_s16 + $0x80] sm:$0xff]  ;;  %v312_v20 = vld [vmem:[%s1513_s16 + $0x90] sm:$0xff]  ;;  %v315_v21 = vld [vmem:[%s1513_s16 + $0xa8] sm:$0xff] }
  0x28   : > { %513 = vmatpush1.msra.mxu0 %v424_v27  ;;  %738 = vmatpush1.msra.mxu1 %v456_v28  ;;  %v317_v22 = vld [vmem:[%s1513_s16 + $0xb8] sm:$0xff]  ;;  %v314_v23 = vld [vmem:[%s1513_s16 + $0xa0] sm:$0xff]  ;;  %v316_v24 = vld [vmem:[%s1513_s16 + $0xb0] sm:$0xff] }
  0x29   : > { %514 = vmatprep.subr.mxu0 %v1232_v2  ;;  %739 = vmatprep.subr.mxu1 %v1232_v2  ;;  %v319_v25 = vld [vmem:[%s1513_s16 + $0xc8] sm:$0xff]  ;;  %v321_v26 = vld [vmem:[%s1513_s16 + $0xd8] sm:$0xff]  ;;  %v318_v27 = vld [vmem:[%s1513_s16 + $0xc0] sm:$0xff] }
  0x2a   : > { %515 = vmatpush1.msra.mxu0 %v423_v29  ;;  %740 = vmatpush1.msra.mxu1 %v455_v30  ;;  %v320_v28 = vld [vmem:[%s1513_s16 + $0xd0] sm:$0xff]  ;;  %v323_v29 = vld [vmem:[%s1513_s16 + $0xe8] sm:$0xff]  ;;  %v325_v30 = vld [vmem:[%s1513_s16 + $0xf8] sm:$0xff] }
  0x2b   : > { %516 = vmatprep.subr.mxu0 %v1232_v2  ;;  %741 = vmatprep.subr.mxu1 %v1232_v2 }
  0x2c   : > { %517 = vmatpush1.msra.mxu0 %v422_v31  ;;  %742 = vmatpush1.msra.mxu1 %v454_v32  ;;  %v322_v31 = vld [vmem:[%s1513_s16 + $0xe0] sm:$0xff]  ;;  %v324_v32 = vld [vmem:[%s1513_s16 + $0xf0] sm:$0xff] }
  0x2d   : > { %518 = vmatprep.subr.mxu0 %v1232_v2  ;;  %743 = vmatprep.subr.mxu1 %v1232_v2 }
  0x2e   : > { %519 = vmatpush2.msra.mxu0 %v453_v33  ;;  %744 = vmatpush2.msra.mxu1 %v485_v34  ;;  %v327_v33 = vld [vmem:[%s1513_s16 + $0x108] sm:$0xff]  ;;  %v329_v34 = vld [vmem:[%s1513_s16 + $0x118] sm:$0xff] }
  0x2f   : > { %520 = vmatprep.subr.mxu0 %v1232_v2  ;;  %745 = vmatprep.subr.mxu1 %v1232_v2 }
  0x30   : > { %521 = vmatpush2.msra.mxu0 %v452_v35  ;;  %746 = vmatpush2.msra.mxu1 %v484_v36  ;;  %v326_v35 = vld [vmem:[%s1513_s16 + $0x100] sm:$0xff]  ;;  %v328_v36 = vld [vmem:[%s1513_s16 + $0x110] sm:$0xff] }
  0x31   : > { %522 = vmatprep.subr.mxu0 %v1232_v2  ;;  %747 = vmatprep.subr.mxu1 %v1232_v2 }
  0x32   : > { %523 = vmatpush2.msra.mxu0 %v451_v37  ;;  %748 = vmatpush2.msra.mxu1 %v483_v38  ;;  %v331_v37 = vld [vmem:[%s1513_s16 + $0x128] sm:$0xff]  ;;  %v333_v38 = vld [vmem:[%s1513_s16 + $0x138] sm:$0xff] }
  0x33   : > { %524 = vmatprep.subr.mxu0 %v1232_v2  ;;  %749 = vmatprep.subr.mxu1 %v1232_v2 }
  0x34   : > { %525 = vmatpush2.msra.mxu0 %v450_v39  ;;  %750 = vmatpush2.msra.mxu1 %v482_v40  ;;  %v330_v39 = vld [vmem:[%s1513_s16 + $0x120] sm:$0xff]  ;;  %v332_v40 = vld [vmem:[%s1513_s16 + $0x130] sm:$0xff] }
  0x35   : > { %526 = vmatprep.subr.mxu0 %v1232_v2  ;;  %751 = vmatprep.subr.mxu1 %v1232_v2 }
  0x36   : > { %527 = vmatpush2.msra.mxu0 %v449_v41  ;;  %752 = vmatpush2.msra.mxu1 %v481_v42  ;;  %v335_v41 = vld [vmem:[%s1513_s16 + $0x148] sm:$0xff]  ;;  %v337_v42 = vld [vmem:[%s1513_s16 + $0x158] sm:$0xff] }
  0x37   : > { %528 = vmatprep.subr.mxu0 %v1232_v2  ;;  %753 = vmatprep.subr.mxu1 %v1232_v2 }
  0x38   : > { %529 = vmatpush2.msra.mxu0 %v448_v43  ;;  %754 = vmatpush2.msra.mxu1 %v480_v44  ;;  %v334_v43 = vld [vmem:[%s1513_s16 + $0x140] sm:$0xff]  ;;  %v336_v44 = vld [vmem:[%s1513_s16 + $0x150] sm:$0xff] }
  0x39   : > { %530 = vmatprep.subr.mxu0 %v1232_v2  ;;  %755 = vmatprep.subr.mxu1 %v1232_v2 }
  0x3a   : > { %531 = vmatpush2.msra.mxu0 %v447_v45  ;;  %756 = vmatpush2.msra.mxu1 %v479_v46  ;;  %v339_v45 = vld [vmem:[%s1513_s16 + $0x168] sm:$0xff]  ;;  %v341_v46 = vld [vmem:[%s1513_s16 + $0x178] sm:$0xff] }
  0x3b   : > { %532 = vmatprep.subr.mxu0 %v1232_v2  ;;  %757 = vmatprep.subr.mxu1 %v1232_v2 }
  0x3c   : > { %533 = vmatpush2.msra.mxu0 %v446_v47  ;;  %758 = vmatpush2.msra.mxu1 %v478_v48  ;;  %v338_v47 = vld [vmem:[%s1513_s16 + $0x160] sm:$0xff]  ;;  %v340_v48 = vld [vmem:[%s1513_s16 + $0x170] sm:$0xff] }
  0x3d   : > { %534 = vmatprep.subr.mxu0 %v1232_v2  ;;  %759 = vmatprep.subr.mxu1 %v1232_v2 }
  0x3e   : > { %535 = vmatpush2.msra.mxu0 %v445_v49  ;;  %760 = vmatpush2.msra.mxu1 %v477_v50  ;;  %v343_v49 = vld [vmem:[%s1513_s16 + $0x188] sm:$0xff]  ;;  %v345_v50 = vld [vmem:[%s1513_s16 + $0x198] sm:$0xff] }
  0x3f   : > { %536 = vmatprep.subr.mxu0 %v1232_v2  ;;  %761 = vmatprep.subr.mxu1 %v1232_v2 }
  0x40   : > { %537 = vmatpush2.msra.mxu0 %v444_v51  ;;  %762 = vmatpush2.msra.mxu1 %v476_v52  ;;  %v342_v51 = vld [vmem:[%s1513_s16 + $0x180] sm:$0xff]  ;;  %v344_v52 = vld [vmem:[%s1513_s16 + $0x190] sm:$0xff] }
  0x41   : > { %538 = vmatprep.subr.mxu0 %v1232_v2  ;;  %763 = vmatprep.subr.mxu1 %v1232_v2 }
  0x42   : > { %539 = vmatpush2.msra.mxu0 %v443_v53  ;;  %764 = vmatpush2.msra.mxu1 %v475_v54  ;;  %v347_v53 = vld [vmem:[%s1513_s16 + $0x1a8] sm:$0xff]  ;;  %v349_v54 = vld [vmem:[%s1513_s16 + $0x1b8] sm:$0xff] }
  0x43   : > { %540 = vmatprep.subr.mxu0 %v1232_v2  ;;  %765 = vmatprep.subr.mxu1 %v1232_v2 }
  0x44   : > { %541 = vmatpush2.msra.mxu0 %v442_v55  ;;  %766 = vmatpush2.msra.mxu1 %v474_v56  ;;  %v346_v55 = vld [vmem:[%s1513_s16 + $0x1a0] sm:$0xff]  ;;  %v348_v56 = vld [vmem:[%s1513_s16 + $0x1b0] sm:$0xff] }
  0x45   : > { %542 = vmatprep.subr.mxu0 %v1232_v2  ;;  %767 = vmatprep.subr.mxu1 %v1232_v2 }
  0x46   : > { %543 = vmatpush2.msra.mxu0 %v441_v57  ;;  %768 = vmatpush2.msra.mxu1 %v473_v58  ;;  %v351_v57 = vld [vmem:[%s1513_s16 + $0x1c8] sm:$0xff]  ;;  %v353_v58 = vld [vmem:[%s1513_s16 + $0x1d8] sm:$0xff] }
  0x47   : > { %544 = vmatprep.subr.mxu0 %v1232_v2  ;;  %769 = vmatprep.subr.mxu1 %v1232_v2 }
  0x48   : > { %545 = vmatpush2.msra.mxu0 %v440_v59  ;;  %770 = vmatpush2.msra.mxu1 %v472_v60  ;;  %v350_v59 = vld [vmem:[%s1513_s16 + $0x1c0] sm:$0xff]  ;;  %v352_v60 = vld [vmem:[%s1513_s16 + $0x1d0] sm:$0xff] }
  0x49   : > { %546 = vmatprep.subr.mxu0 %v1232_v2  ;;  %771 = vmatprep.subr.mxu1 %v1232_v2 }
  0x4a   : > { %547 = vmatpush2.msra.mxu0 %v439_v61  ;;  %772 = vmatpush2.msra.mxu1 %v471_v62  ;;  %v355_v61 = vld [vmem:[%s1513_s16 + $0x1e8] sm:$0xff]  ;;  %v357_v62 = vld [vmem:[%s1513_s16 + $0x1f8] sm:$0xff] }
  0x4b   : > { %548 = vmatprep.subr.mxu0 %v1232_v2  ;;  %773 = vmatprep.subr.mxu1 %v1232_v2  ;;  %v300_v2 = vld [vmem:[%s1513_s16 + $0x30] sm:$0xff] }
  0x4c   : > { %549 = vmatpush2.msra.mxu0 %v438_v63  ;;  %550 = vmatprep.mubr.f32.mxu0 %v295_v0  ;;  %v354_v63 = vld [vmem:[%s1513_s16 + $0x1e0] sm:$0xff]  ;;  %v356_v0 = vld [vmem:[%s1513_s16 + $0x1f0] sm:$0xff] }
  0x4d   : > { %774 = vmatpush2.msra.mxu1 %v470_v1  ;;  %775 = vmatprep.mubr.f32.mxu1 %v297_v3  ;;  %v359_v1 = vld [vmem:[%s1513_s16 + $0x208] sm:$0xff]  ;;  %v361_v3 = vld [vmem:[%s1513_s16 + $0x218] sm:$0xff] }
  0x4e   : > { %551 = vmatmul.mubr.f32.vlgmr.msra.gmra.mxu0 %v294_v4  ;;  %776 = vmatmul.mubr.f32.vlgmr.msra.gmra.mxu1 %v296_v5  ;;  %v358_v4 = vld [vmem:[%s1513_s16 + $0x200] sm:$0xff]  ;;  %v360_v5 = vld [vmem:[%s1513_s16 + $0x210] sm:$0xff] }
  0x4f   : > { %555 = vmatprep.mubr.f32.mxu0 %v299_v6  ;;  %780 = vmatprep.mubr.f32.mxu1 %v301_v7  ;;  %v363_v6 = vld [vmem:[%s1513_s16 + $0x228] sm:$0xff]  ;;  %v365_v7 = vld [vmem:[%s1513_s16 + $0x238] sm:$0xff] }
  0x52   : > { %556 = vmatmul.mubr.f32.gmra.mxu0 %v298_v8  ;;  %781 = vmatmul.mubr.f32.gmra.mxu1 %v300_v2  ;;  %v362_v8 = vld [vmem:[%s1513_s16 + $0x220] sm:$0xff]  ;;  %v364_v2 = vld [vmem:[%s1513_s16 + $0x230] sm:$0xff] }
  0x53   : > { %560 = vmatprep.mubr.f32.mxu0 %v303_v9  ;;  %785 = vmatprep.mubr.f32.mxu1 %v305_v10  ;;  %v367_v9 = vld [vmem:[%s1513_s16 + $0x248] sm:$0xff]  ;;  %v369_v10 = vld [vmem:[%s1513_s16 + $0x258] sm:$0xff] }
  0x56   : > { %561 = vmatmul.mubr.f32.gmra.mxu0 %v302_v11  ;;  %786 = vmatmul.mubr.f32.gmra.mxu1 %v304_v12  ;;  %v366_v11 = vld [vmem:[%s1513_s16 + $0x240] sm:$0xff]  ;;  %v368_v12 = vld [vmem:[%s1513_s16 + $0x250] sm:$0xff] }
  0x57   : > { %565 = vmatprep.mubr.f32.mxu0 %v307_v13  ;;  %790 = vmatprep.mubr.f32.mxu1 %v309_v14  ;;  %v371_v13 = vld [vmem:[%s1513_s16 + $0x268] sm:$0xff]  ;;  %v373_v14 = vld [vmem:[%s1513_s16 + $0x278] sm:$0xff] }
  0x5a   : > { %566 = vmatmul.mubr.f32.gmra.mxu0 %v306_v15  ;;  %791 = vmatmul.mubr.f32.gmra.mxu1 %v308_v16  ;;  %v370_v15 = vld [vmem:[%s1513_s16 + $0x260] sm:$0xff]  ;;  %v372_v16 = vld [vmem:[%s1513_s16 + $0x270] sm:$0xff] }
  0x5b   : > { %570 = vmatprep.mubr.f32.mxu0 %v311_v17  ;;  %795 = vmatprep.mubr.f32.mxu1 %v313_v18  ;;  %v375_v17 = vld [vmem:[%s1513_s16 + $0x288] sm:$0xff]  ;;  %v377_v18 = vld [vmem:[%s1513_s16 + $0x298] sm:$0xff] }
  0x5e   : > { %571 = vmatmul.mubr.f32.gmra.mxu0 %v310_v19  ;;  %796 = vmatmul.mubr.f32.gmra.mxu1 %v312_v20  ;;  %v374_v19 = vld [vmem:[%s1513_s16 + $0x280] sm:$0xff]  ;;  %v376_v20 = vld [vmem:[%s1513_s16 + $0x290] sm:$0xff] }
  0x5f   : > { %575 = vmatprep.mubr.f32.mxu0 %v315_v21  ;;  %800 = vmatprep.mubr.f32.mxu1 %v317_v22  ;;  %v379_v21 = vld [vmem:[%s1513_s16 + $0x2a8] sm:$0xff]  ;;  %v381_v22 = vld [vmem:[%s1513_s16 + $0x2b8] sm:$0xff] }
  0x62   : > { %576 = vmatmul.mubr.f32.gmra.mxu0 %v314_v23  ;;  %801 = vmatmul.mubr.f32.gmra.mxu1 %v316_v24  ;;  %v378_v23 = vld [vmem:[%s1513_s16 + $0x2a0] sm:$0xff]  ;;  %v380_v24 = vld [vmem:[%s1513_s16 + $0x2b0] sm:$0xff] }
  0x63   : > { %580 = vmatprep.mubr.f32.mxu0 %v319_v25  ;;  %805 = vmatprep.mubr.f32.mxu1 %v321_v26  ;;  %v383_v25 = vld [vmem:[%s1513_s16 + $0x2c8] sm:$0xff]  ;;  %v385_v26 = vld [vmem:[%s1513_s16 + $0x2d8] sm:$0xff] }
  0x66   : > { %581 = vmatmul.mubr.f32.gmra.mxu0 %v318_v27  ;;  %806 = vmatmul.mubr.f32.gmra.mxu1 %v320_v28  ;;  %v382_v27 = vld [vmem:[%s1513_s16 + $0x2c0] sm:$0xff]  ;;  %v384_v28 = vld [vmem:[%s1513_s16 + $0x2d0] sm:$0xff] }
  0x67   : > { %585 = vmatprep.mubr.f32.mxu0 %v323_v29  ;;  %810 = vmatprep.mubr.f32.mxu1 %v325_v30  ;;  %v387_v29 = vld [vmem:[%s1513_s16 + $0x2e8] sm:$0xff]  ;;  %v389_v30 = vld [vmem:[%s1513_s16 + $0x2f8] sm:$0xff] }
  0x6a   : > { %586 = vmatmul.mubr.f32.gmra.mxu0 %v322_v31  ;;  %811 = vmatmul.mubr.f32.gmra.mxu1 %v324_v32  ;;  %v386_v31 = vld [vmem:[%s1513_s16 + $0x2e0] sm:$0xff]  ;;  %v388_v32 = vld [vmem:[%s1513_s16 + $0x2f0] sm:$0xff] }
  0x6b   : > { %590 = vmatprep.mubr.f32.mxu0 %v327_v33  ;;  %815 = vmatprep.mubr.f32.mxu1 %v329_v34  ;;  %v391_v33 = vld [vmem:[%s1513_s16 + $0x308] sm:$0xff]  ;;  %v393_v34 = vld [vmem:[%s1513_s16 + $0x318] sm:$0xff] }
  0x6e   : > { %591 = vmatmul.mubr.f32.gmra.mxu0 %v326_v35  ;;  %816 = vmatmul.mubr.f32.gmra.mxu1 %v328_v36  ;;  %v390_v35 = vld [vmem:[%s1513_s16 + $0x300] sm:$0xff]  ;;  %v392_v36 = vld [vmem:[%s1513_s16 + $0x310] sm:$0xff] }
  0x6f   : > { %595 = vmatprep.mubr.f32.mxu0 %v331_v37  ;;  %820 = vmatprep.mubr.f32.mxu1 %v333_v38  ;;  %v395_v37 = vld [vmem:[%s1513_s16 + $0x328] sm:$0xff]  ;;  %v397_v38 = vld [vmem:[%s1513_s16 + $0x338] sm:$0xff] }
  0x72   : > { %596 = vmatmul.mubr.f32.gmra.mxu0 %v330_v39  ;;  %821 = vmatmul.mubr.f32.gmra.mxu1 %v332_v40  ;;  %v394_v39 = vld [vmem:[%s1513_s16 + $0x320] sm:$0xff]  ;;  %v396_v40 = vld [vmem:[%s1513_s16 + $0x330] sm:$0xff] }
  0x73   : > { %600 = vmatprep.mubr.f32.mxu0 %v335_v41  ;;  %825 = vmatprep.mubr.f32.mxu1 %v337_v42  ;;  %v399_v41 = vld [vmem:[%s1513_s16 + $0x348] sm:$0xff]  ;;  %v401_v42 = vld [vmem:[%s1513_s16 + $0x358] sm:$0xff] }
  0x76   : > { %601 = vmatmul.mubr.f32.gmra.mxu0 %v334_v43  ;;  %826 = vmatmul.mubr.f32.gmra.mxu1 %v336_v44  ;;  %v398_v43 = vld [vmem:[%s1513_s16 + $0x340] sm:$0xff]  ;;  %v400_v44 = vld [vmem:[%s1513_s16 + $0x350] sm:$0xff] }
  0x77   : > { %605 = vmatprep.mubr.f32.mxu0 %v339_v45  ;;  %830 = vmatprep.mubr.f32.mxu1 %v341_v46  ;;  %v403_v45 = vld [vmem:[%s1513_s16 + $0x368] sm:$0xff]  ;;  %v405_v46 = vld [vmem:[%s1513_s16 + $0x378] sm:$0xff] }
  0x7a   : > { %606 = vmatmul.mubr.f32.gmra.mxu0 %v338_v47  ;;  %831 = vmatmul.mubr.f32.gmra.mxu1 %v340_v48  ;;  %v402_v47 = vld [vmem:[%s1513_s16 + $0x360] sm:$0xff]  ;;  %v404_v48 = vld [vmem:[%s1513_s16 + $0x370] sm:$0xff] }
  0x7b   : > { %610 = vmatprep.mubr.f32.mxu0 %v343_v49  ;;  %835 = vmatprep.mubr.f32.mxu1 %v345_v50  ;;  %v407_v49 = vld [vmem:[%s1513_s16 + $0x388] sm:$0xff]  ;;  %v409_v50 = vld [vmem:[%s1513_s16 + $0x398] sm:$0xff] }
  0x7e   : > { %611 = vmatmul.mubr.f32.gmra.mxu0 %v342_v51  ;;  %836 = vmatmul.mubr.f32.gmra.mxu1 %v344_v52  ;;  %v406_v51 = vld [vmem:[%s1513_s16 + $0x380] sm:$0xff]  ;;  %v408_v52 = vld [vmem:[%s1513_s16 + $0x390] sm:$0xff] }
  0x7f   : > { %615 = vmatprep.mubr.f32.mxu0 %v347_v53  ;;  %840 = vmatprep.mubr.f32.mxu1 %v349_v54  ;;  %v411_v53 = vld [vmem:[%s1513_s16 + $0x3a8] sm:$0xff]  ;;  %v413_v54 = vld [vmem:[%s1513_s16 + $0x3b8] sm:$0xff] }
  0x82   : > { %616 = vmatmul.mubr.f32.gmra.mxu0 %v346_v55  ;;  %841 = vmatmul.mubr.f32.gmra.mxu1 %v348_v56  ;;  %v410_v55 = vld [vmem:[%s1513_s16 + $0x3a0] sm:$0xff]  ;;  %v412_v56 = vld [vmem:[%s1513_s16 + $0x3b0] sm:$0xff] }
  0x83   : > { %620 = vmatprep.mubr.f32.mxu0 %v351_v57  ;;  %845 = vmatprep.mubr.f32.mxu1 %v353_v58  ;;  %v415_v57 = vld [vmem:[%s1513_s16 + $0x3c8] sm:$0xff]  ;;  %v417_v58 = vld [vmem:[%s1513_s16 + $0x3d8] sm:$0xff] }
  0x86   : > { %621 = vmatmul.mubr.f32.gmra.mxu0 %v350_v59  ;;  %846 = vmatmul.mubr.f32.gmra.mxu1 %v352_v60  ;;  %v414_v59 = vld [vmem:[%s1513_s16 + $0x3c0] sm:$0xff]  ;;  %v416_v60 = vld [vmem:[%s1513_s16 + $0x3d0] sm:$0xff] }
  0x87   : > { %625 = vmatprep.mubr.f32.mxu0 %v355_v61  ;;  %850 = vmatprep.mubr.f32.mxu1 %v357_v62  ;;  %v419_v61 = vld [vmem:[%s1513_s16 + $0x3e8] sm:$0xff]  ;;  %v421_v62 = vld [vmem:[%s1513_s16 + $0x3f8] sm:$0xff] }
  0x8a   : > { %626 = vmatmul.mubr.f32.gmra.mxu0 %v354_v63  ;;  %851 = vmatmul.mubr.f32.gmra.mxu1 %v356_v0  ;;  %v418_v63 = vld [vmem:[%s1513_s16 + $0x3e0] sm:$0xff]  ;;  %v420_v0 = vld [vmem:[%s1513_s16 + $0x3f0] sm:$0xff] }
  0x8b   : > { %630 = vmatprep.mubr.f32.mxu0 %v359_v1  ;;  %855 = vmatprep.mubr.f32.mxu1 %v361_v3 }
  0x8e   : > { %631 = vmatmul.mubr.f32.gmra.mxu0 %v358_v4  ;;  %856 = vmatmul.mubr.f32.gmra.mxu1 %v360_v5 }
  0x8f   : > { %635 = vmatprep.mubr.f32.mxu0 %v363_v6  ;;  %860 = vmatprep.mubr.f32.mxu1 %v365_v7 }
  0x92   : > { %636 = vmatmul.mubr.f32.gmra.mxu0 %v362_v8  ;;  %861 = vmatmul.mubr.f32.gmra.mxu1 %v364_v2 }
  0x93   : > { %640 = vmatprep.mubr.f32.mxu0 %v367_v9  ;;  %865 = vmatprep.mubr.f32.mxu1 %v369_v10 }
  0x96   : > { %641 = vmatmul.mubr.f32.gmra.mxu0 %v366_v11  ;;  %866 = vmatmul.mubr.f32.gmra.mxu1 %v368_v12 }
  0x97   : > { %645 = vmatprep.mubr.f32.mxu0 %v371_v13  ;;  %870 = vmatprep.mubr.f32.mxu1 %v373_v14 }
  0x9a   : > { %646 = vmatmul.mubr.f32.gmra.mxu0 %v370_v15  ;;  %871 = vmatmul.mubr.f32.gmra.mxu1 %v372_v16 }
  0x9b   : > { %650 = vmatprep.mubr.f32.mxu0 %v375_v17  ;;  %875 = vmatprep.mubr.f32.mxu1 %v377_v18 }
  0x9e   : > { %651 = vmatmul.mubr.f32.gmra.mxu0 %v374_v19  ;;  %876 = vmatmul.mubr.f32.gmra.mxu1 %v376_v20 }
  0x9f   : > { %655 = vmatprep.mubr.f32.mxu0 %v379_v21  ;;  %880 = vmatprep.mubr.f32.mxu1 %v381_v22 }
  0xa2   : > { %656 = vmatmul.mubr.f32.gmra.mxu0 %v378_v23  ;;  %881 = vmatmul.mubr.f32.gmra.mxu1 %v380_v24 }
  0xa3   : > { %660 = vmatprep.mubr.f32.mxu0 %v383_v25  ;;  %885 = vmatprep.mubr.f32.mxu1 %v385_v26 }
  0xa6   : > { %661 = vmatmul.mubr.f32.gmra.mxu0 %v382_v27  ;;  %886 = vmatmul.mubr.f32.gmra.mxu1 %v384_v28 }
  0xa7   : > { %665 = vmatprep.mubr.f32.mxu0 %v387_v29  ;;  %890 = vmatprep.mubr.f32.mxu1 %v389_v30 }
  0xaa   : > { %666 = vmatmul.mubr.f32.gmra.mxu0 %v386_v31  ;;  %891 = vmatmul.mubr.f32.gmra.mxu1 %v388_v32 }
  0xab   : > { %670 = vmatprep.mubr.f32.mxu0 %v391_v33  ;;  %895 = vmatprep.mubr.f32.mxu1 %v393_v34 }
  0xae   : > { %671 = vmatmul.mubr.f32.gmra.mxu0 %v390_v35  ;;  %896 = vmatmul.mubr.f32.gmra.mxu1 %v392_v36 }
  0xaf   : > { %675 = vmatprep.mubr.f32.mxu0 %v395_v37  ;;  %900 = vmatprep.mubr.f32.mxu1 %v397_v38 }
  0xb2   : > { %676 = vmatmul.mubr.f32.gmra.mxu0 %v394_v39  ;;  %901 = vmatmul.mubr.f32.gmra.mxu1 %v396_v40 }
  0xb3   : > { %680 = vmatprep.mubr.f32.mxu0 %v399_v41  ;;  %905 = vmatprep.mubr.f32.mxu1 %v401_v42 }
  0xb6   : > { %681 = vmatmul.mubr.f32.gmra.mxu0 %v398_v43  ;;  %906 = vmatmul.mubr.f32.gmra.mxu1 %v400_v44 }
  0xb7   : > { %685 = vmatprep.mubr.f32.mxu0 %v403_v45  ;;  %910 = vmatprep.mubr.f32.mxu1 %v405_v46 }
  0xba   : > { %686 = vmatmul.mubr.f32.gmra.mxu0 %v402_v47  ;;  %911 = vmatmul.mubr.f32.gmra.mxu1 %v404_v48 }
  0xbb   : > { %690 = vmatprep.mubr.f32.mxu0 %v407_v49  ;;  %915 = vmatprep.mubr.f32.mxu1 %v409_v50 }
  0xbe   : > { %691 = vmatmul.mubr.f32.gmra.mxu0 %v406_v51  ;;  %916 = vmatmul.mubr.f32.gmra.mxu1 %v408_v52 }
  0xbf   : > { %695 = vmatprep.mubr.f32.mxu0 %v411_v53  ;;  %920 = vmatprep.mubr.f32.mxu1 %v413_v54 }
  0xc2   : > { %696 = vmatmul.mubr.f32.gmra.mxu0 %v410_v55  ;;  %921 = vmatmul.mubr.f32.gmra.mxu1 %v412_v56 }
  0xc3   : > { %700 = vmatprep.mubr.f32.mxu0 %v415_v57  ;;  %925 = vmatprep.mubr.f32.mxu1 %v417_v58 }
  0xc6   : > { %701 = vmatmul.mubr.f32.gmra.mxu0 %v414_v59  ;;  %926 = vmatmul.mubr.f32.gmra.mxu1 %v416_v60 }
  0xc7   : > { %705 = vmatprep.mubr.f32.mxu0 %v419_v61  ;;  %930 = vmatprep.mubr.f32.mxu1 %v421_v62 }
  0xca   : > { %706 = vmatmul.mubr.f32.gmra.mxu0 %v418_v63  ;;  %931 = vmatmul.mubr.f32.gmra.mxu1 %v420_v0 }
 0x10e   : > { %v552_v1 = vpop.f32.mrf.mxu0  ;;  %v777_v3 = vpop.f32.mrf.mxu1 }
 0x10f   : > { %v778_v4 = vadd.f32 %v777_v3, %v552_v1 }
 0x110   : > { %v554_v5 = vpop.f32.mrf.mxu0  ;;  %v779_v6 = vpop.f32.mrf.mxu1 }
 0x111   : > { %1035 = vst [vmem:[%s1665_s28] sm:$0xff] %v778_v4 }
 0x112   : > { %v557_v7 = vpop.f32.mrf.mxu0  ;;  %v782_v8 = vpop.f32.mrf.mxu1 }
 0x113   : > { %v783_v2 = vadd.f32 %v782_v8, %v557_v7 }
 0x114   : > { %v559_v9 = vpop.f32.mrf.mxu0  ;;  %v784_v10 = vpop.f32.mrf.mxu1 }
 0x115   : > { %1036 = vst [vmem:[%s1665_s28 + $0x8] sm:$0xff] %v783_v2 }
 0x116   : > { %v562_v11 = vpop.f32.mrf.mxu0  ;;  %v787_v12 = vpop.f32.mrf.mxu1 }
 0x117   : > { %v788_v13 = vadd.f32 %v787_v12, %v562_v11 }
 0x118   : > { %v564_v14 = vpop.f32.mrf.mxu0  ;;  %v789_v15 = vpop.f32.mrf.mxu1 }
 0x119   : > { %1037 = vst [vmem:[%s1665_s28 + $0x10] sm:$0xff] %v788_v13 }
 0x11a   : > { %v567_v16 = vpop.f32.mrf.mxu0  ;;  %v792_v17 = vpop.f32.mrf.mxu1 }
 0x11b   : > { %v793_v18 = vadd.f32 %v792_v17, %v567_v16 }
 0x11c   : > { %v569_v19 = vpop.f32.mrf.mxu0  ;;  %v794_v20 = vpop.f32.mrf.mxu1 }
 0x11d   : > { %1038 = vst [vmem:[%s1665_s28 + $0x18] sm:$0xff] %v793_v18 }
 0x11e   : > { %v572_v21 = vpop.f32.mrf.mxu0  ;;  %v797_v22 = vpop.f32.mrf.mxu1 }
 0x11f   : > { %v798_v23 = vadd.f32 %v797_v22, %v572_v21 }
 0x120   : > { %v574_v24 = vpop.f32.mrf.mxu0  ;;  %v799_v25 = vpop.f32.mrf.mxu1 }
 0x121   : > { %1039 = vst [vmem:[%s1665_s28 + $0x20] sm:$0xff] %v798_v23 }
 0x122   : > { %v577_v26 = vpop.f32.mrf.mxu0  ;;  %v802_v27 = vpop.f32.mrf.mxu1 }
 0x123   : > { %v803_v28 = vadd.f32 %v802_v27, %v577_v26 }
 0x124   : > { %v579_v29 = vpop.f32.mrf.mxu0  ;;  %v804_v30 = vpop.f32.mrf.mxu1 }
 0x125   : > { %1040 = vst [vmem:[%s1665_s28 + $0x28] sm:$0xff] %v803_v28 }
 0x126   : > { %v582_v31 = vpop.f32.mrf.mxu0  ;;  %v807_v32 = vpop.f32.mrf.mxu1 }
 0x127   : > { %v808_v33 = vadd.f32 %v807_v32, %v582_v31 }
 0x128   : > { %v584_v34 = vpop.f32.mrf.mxu0  ;;  %v809_v35 = vpop.f32.mrf.mxu1 }
 0x129   : > { %1041 = vst [vmem:[%s1665_s28 + $0x30] sm:$0xff] %v808_v33 }
 0x12a   : > { %v587_v36 = vpop.f32.mrf.mxu0  ;;  %v812_v37 = vpop.f32.mrf.mxu1 }
 0x12b   : > { %v813_v38 = vadd.f32 %v812_v37, %v587_v36 }
 0x12c   : > { %v589_v39 = vpop.f32.mrf.mxu0  ;;  %v814_v40 = vpop.f32.mrf.mxu1 }
 0x12d   : > { %1042 = vst [vmem:[%s1665_s28 + $0x38] sm:$0xff] %v813_v38 }
 0x12e   : > { %v592_v41 = vpop.f32.mrf.mxu0  ;;  %v817_v42 = vpop.f32.mrf.mxu1 }
 0x12f   : > { %v818_v43 = vadd.f32 %v817_v42, %v592_v41 }
 0x130   : > { %v594_v44 = vpop.f32.mrf.mxu0  ;;  %v819_v45 = vpop.f32.mrf.mxu1 }
 0x131   : > { %1043 = vst [vmem:[%s1665_s28 + $0x40] sm:$0xff] %v818_v43 }
 0x132   : > { %v597_v46 = vpop.f32.mrf.mxu0  ;;  %v822_v47 = vpop.f32.mrf.mxu1 }
 0x133   : > { %v823_v48 = vadd.f32 %v822_v47, %v597_v46 }
 0x134   : > { %v599_v49 = vpop.f32.mrf.mxu0  ;;  %v824_v50 = vpop.f32.mrf.mxu1 }
 0x135   : > { %1044 = vst [vmem:[%s1665_s28 + $0x48] sm:$0xff] %v823_v48 }
 0x136   : > { %v602_v51 = vpop.f32.mrf.mxu0  ;;  %v827_v52 = vpop.f32.mrf.mxu1 }
 0x137   : > { %v828_v53 = vadd.f32 %v827_v52, %v602_v51 }
 0x138   : > { %v604_v54 = vpop.f32.mrf.mxu0  ;;  %v829_v55 = vpop.f32.mrf.mxu1 }
 0x139   : > { %1045 = vst [vmem:[%s1665_s28 + $0x50] sm:$0xff] %v828_v53 }
 0x13a   : > { %v607_v56 = vpop.f32.mrf.mxu0  ;;  %v832_v57 = vpop.f32.mrf.mxu1 }
 0x13b   : > { %v833_v58 = vadd.f32 %v832_v57, %v607_v56 }
 0x13c   : > { %v609_v59 = vpop.f32.mrf.mxu0  ;;  %v834_v60 = vpop.f32.mrf.mxu1 }
 0x13d   : > { %1046 = vst [vmem:[%s1665_s28 + $0x58] sm:$0xff] %v833_v58 }
 0x13e   : > { %v612_v61 = vpop.f32.mrf.mxu0  ;;  %v837_v62 = vpop.f32.mrf.mxu1 }
 0x13f   : > { %v838_v63 = vadd.f32 %v837_v62, %v612_v61 }
 0x140   : > { %v614_v0 = vpop.f32.mrf.mxu0  ;;  %v839_v1 = vpop.f32.mrf.mxu1 }
 0x141   : > { %1047 = vst [vmem:[%s1665_s28 + $0x60] sm:$0xff] %v838_v63 }
 0x142   : > { %v617_v3 = vpop.f32.mrf.mxu0  ;;  %v842_v4 = vpop.f32.mrf.mxu1 }
 0x143   : > { %v843_v5 = vadd.f32 %v842_v4, %v617_v3 }
 0x144   : > { %v619_v6 = vpop.f32.mrf.mxu0  ;;  %v844_v7 = vpop.f32.mrf.mxu1 }
 0x145   : > { %1048 = vst [vmem:[%s1665_s28 + $0x68] sm:$0xff] %v843_v5 }
 0x146   : > { %v622_v8 = vpop.f32.mrf.mxu0  ;;  %v847_v2 = vpop.f32.mrf.mxu1 }
 0x147   : > { %v848_v9 = vadd.f32 %v847_v2, %v622_v8 }
 0x148   : > { %v624_v10 = vpop.f32.mrf.mxu0  ;;  %v849_v11 = vpop.f32.mrf.mxu1 }
 0x149   : > { %1049 = vst [vmem:[%s1665_s28 + $0x70] sm:$0xff] %v848_v9 }
 0x14a   : > { %v627_v12 = vpop.f32.mrf.mxu0  ;;  %v852_v13 = vpop.f32.mrf.mxu1 }
 0x14b   : > { %v853_v14 = vadd.f32 %v852_v13, %v627_v12 }
 0x14c   : > { %v629_v15 = vpop.f32.mrf.mxu0  ;;  %v854_v16 = vpop.f32.mrf.mxu1 }
 0x14d   : > { %1050 = vst [vmem:[%s1665_s28 + $0x78] sm:$0xff] %v853_v14 }
 0x14e   : > { %v632_v17 = vpop.f32.mrf.mxu0  ;;  %v857_v18 = vpop.f32.mrf.mxu1 }
 0x14f   : > { %v858_v19 = vadd.f32 %v857_v18, %v632_v17 }
 0x150   : > { %v634_v20 = vpop.f32.mrf.mxu0  ;;  %v859_v21 = vpop.f32.mrf.mxu1 }
 0x151   : > { %1051 = vst [vmem:[%s1665_s28 + $0x80] sm:$0xff] %v858_v19 }
 0x152   : > { %v637_v22 = vpop.f32.mrf.mxu0  ;;  %v862_v23 = vpop.f32.mrf.mxu1 }
 0x153   : > { %v863_v24 = vadd.f32 %v862_v23, %v637_v22 }
 0x154   : > { %v639_v25 = vpop.f32.mrf.mxu0  ;;  %v864_v26 = vpop.f32.mrf.mxu1 }
 0x155   : > { %1052 = vst [vmem:[%s1665_s28 + $0x88] sm:$0xff] %v863_v24 }
 0x156   : > { %v642_v27 = vpop.f32.mrf.mxu0  ;;  %v867_v28 = vpop.f32.mrf.mxu1 }
 0x157   : > { %v868_v29 = vadd.f32 %v867_v28, %v642_v27 }
 0x158   : > { %v644_v30 = vpop.f32.mrf.mxu0  ;;  %v869_v31 = vpop.f32.mrf.mxu1 }
 0x159   : > { %1053 = vst [vmem:[%s1665_s28 + $0x90] sm:$0xff] %v868_v29 }
 0x15a   : > { %v647_v32 = vpop.f32.mrf.mxu0  ;;  %v872_v33 = vpop.f32.mrf.mxu1 }
 0x15b   : > { %v873_v34 = vadd.f32 %v872_v33, %v647_v32 }
 0x15c   : > { %v649_v35 = vpop.f32.mrf.mxu0  ;;  %v874_v36 = vpop.f32.mrf.mxu1 }
 0x15d   : > { %1054 = vst [vmem:[%s1665_s28 + $0x98] sm:$0xff] %v873_v34 }
 0x15e   : > { %v652_v37 = vpop.f32.mrf.mxu0  ;;  %v877_v38 = vpop.f32.mrf.mxu1 }
 0x15f   : > { %v878_v39 = vadd.f32 %v877_v38, %v652_v37 }
 0x160   : > { %v654_v40 = vpop.f32.mrf.mxu0  ;;  %v879_v41 = vpop.f32.mrf.mxu1 }
 0x161   : > { %1055 = vst [vmem:[%s1665_s28 + $0xa0] sm:$0xff] %v878_v39 }
 0x162   : > { %v657_v42 = vpop.f32.mrf.mxu0  ;;  %v882_v43 = vpop.f32.mrf.mxu1 }
 0x163   : > { %v883_v44 = vadd.f32 %v882_v43, %v657_v42 }
 0x164   : > { %v659_v45 = vpop.f32.mrf.mxu0  ;;  %v884_v46 = vpop.f32.mrf.mxu1 }
 0x165   : > { %1056 = vst [vmem:[%s1665_s28 + $0xa8] sm:$0xff] %v883_v44 }
 0x166   : > { %v662_v47 = vpop.f32.mrf.mxu0  ;;  %v887_v48 = vpop.f32.mrf.mxu1 }
 0x167   : > { %v888_v49 = vadd.f32 %v887_v48, %v662_v47 }
 0x168   : > { %v664_v50 = vpop.f32.mrf.mxu0  ;;  %v889_v51 = vpop.f32.mrf.mxu1 }
 0x169   : > { %1057 = vst [vmem:[%s1665_s28 + $0xb0] sm:$0xff] %v888_v49 }
 0x16a   : > { %v667_v52 = vpop.f32.mrf.mxu0  ;;  %v892_v53 = vpop.f32.mrf.mxu1 }
 0x16b   : > { %v893_v54 = vadd.f32 %v892_v53, %v667_v52 }
 0x16c   : > { %v669_v55 = vpop.f32.mrf.mxu0  ;;  %v894_v56 = vpop.f32.mrf.mxu1 }
 0x16d   : > { %1058 = vst [vmem:[%s1665_s28 + $0xb8] sm:$0xff] %v893_v54 }
 0x16e   : > { %v672_v57 = vpop.f32.mrf.mxu0  ;;  %v897_v58 = vpop.f32.mrf.mxu1 }
 0x16f   : > { %v898_v59 = vadd.f32 %v897_v58, %v672_v57 }
 0x170   : > { %v674_v60 = vpop.f32.mrf.mxu0  ;;  %v899_v61 = vpop.f32.mrf.mxu1 }
 0x171   : > { %1059 = vst [vmem:[%s1665_s28 + $0xc0] sm:$0xff] %v898_v59 }
 0x172   : > { %v677_v62 = vpop.f32.mrf.mxu0  ;;  %v902_v63 = vpop.f32.mrf.mxu1 }
 0x173   : > { %v903_v0 = vadd.f32 %v902_v63, %v677_v62 }
 0x174   : > { %v679_v1 = vpop.f32.mrf.mxu0  ;;  %v904_v3 = vpop.f32.mrf.mxu1 }
 0x175   : > { %1060 = vst [vmem:[%s1665_s28 + $0xc8] sm:$0xff] %v903_v0 }
 0x176   : > { %v682_v4 = vpop.f32.mrf.mxu0  ;;  %v907_v5 = vpop.f32.mrf.mxu1 }
 0x177   : > { %v908_v6 = vadd.f32 %v907_v5, %v682_v4 }
 0x178   : > { %v684_v7 = vpop.f32.mrf.mxu0  ;;  %v909_v8 = vpop.f32.mrf.mxu1 }
 0x179   : > { %1061 = vst [vmem:[%s1665_s28 + $0xd0] sm:$0xff] %v908_v6 }
 0x17a   : > { %v687_v2 = vpop.f32.mrf.mxu0  ;;  %v912_v9 = vpop.f32.mrf.mxu1 }
 0x17b   : > { %v913_v10 = vadd.f32 %v912_v9, %v687_v2 }
 0x17c   : > { %v689_v11 = vpop.f32.mrf.mxu0  ;;  %v914_v12 = vpop.f32.mrf.mxu1 }
 0x17d   : > { %1062 = vst [vmem:[%s1665_s28 + $0xd8] sm:$0xff] %v913_v10 }
 0x17e   : > { %v692_v13 = vpop.f32.mrf.mxu0  ;;  %v917_v14 = vpop.f32.mrf.mxu1 }
 0x17f   : > { %v918_v15 = vadd.f32 %v917_v14, %v692_v13 }
 0x180   : > { %v694_v16 = vpop.f32.mrf.mxu0  ;;  %v919_v17 = vpop.f32.mrf.mxu1 }
 0x181   : > { %1063 = vst [vmem:[%s1665_s28 + $0xe0] sm:$0xff] %v918_v15 }
 0x182   : > { %v697_v18 = vpop.f32.mrf.mxu0  ;;  %v922_v19 = vpop.f32.mrf.mxu1 }
 0x183   : > { %v923_v20 = vadd.f32 %v922_v19, %v697_v18 }
 0x184   : > { %v699_v21 = vpop.f32.mrf.mxu0  ;;  %v924_v22 = vpop.f32.mrf.mxu1 }
 0x185   : > { %1064 = vst [vmem:[%s1665_s28 + $0xe8] sm:$0xff] %v923_v20 }
 0x186   : > { %v702_v23 = vpop.f32.mrf.mxu0  ;;  %v927_v24 = vpop.f32.mrf.mxu1 }
 0x187   : > { %v928_v25 = vadd.f32 %v927_v24, %v702_v23 }
 0x188   : > { %v704_v26 = vpop.f32.mrf.mxu0  ;;  %v929_v27 = vpop.f32.mrf.mxu1 }
 0x189   : > { %1065 = vst [vmem:[%s1665_s28 + $0xf0] sm:$0xff] %v928_v25 }
 0x18a   : > { %v707_v28 = vpop.f32.mrf.mxu0  ;;  %v932_v29 = vpop.f32.mrf.mxu1 }
 0x18b   : > { %v933_v30 = vadd.f32 %v932_v29, %v707_v28 }
 0x18c   : > { %v709_v31 = vpop.f32.mrf.mxu0  ;;  %v934_v32 = vpop.f32.mrf.mxu1 }
 0x18d   : > { %1066 = vst [vmem:[%s1665_s28 + $0xf8] sm:$0xff] %v933_v30 }
 0x18e PF: > { %s12_s11 = sadd.s32 1, %s1230_s11   ;;  %s1711_s9 = smov %s1226_s10 }
 0x18f   : > { %p9_p5 = scmp.ge.s32.totalorder %s12_s11, 4   ;;  %s1712_s10 = smov %s1714_s12 }
 0x191   :  { %11 = sbr.rel (!%p9_p5) target bundleno = 2 (0x2), region = 69 }

</bundles_post_ra>
